<compile_context>
chip_gen: v6e
topology: v6e:2x2x1
jax: 0.10.0
libtpu: 0.0.40
codegen_flags: <defaults>
</compile_context>

<pallas_src>
import functools

import jax
import jax.numpy as jnp
from jax.experimental import pallas as pl
from jax.experimental.pallas import tpu as pltpu

C_IN = 3
C_OUT = 44
KH = KW = 3
EPS = 1e-5

K_RAW = KH * KW * C_IN      # 27
K_PAD = 32                  # contraction dim padded to a sublane-friendly size
C_PAD = 128                 # channel dim padded to full lane width
TILE_M = 512                # rows (= N*H*W) per tile; multiple of 256 and 8


# ---------------------------------------------------------------------------
# Fused kernel: phase 0 = conv matmul + stats; phase 1 = BN fold + BN+ReLU.
# ---------------------------------------------------------------------------
def fused_conv_bn_relu_kernel(inv_rows, p_ref, w_ref, g_ref, b_ref, o_ref,
                              y_vmem, sum_vmem, ssq_vmem,
                              scale_vmem, shift_vmem):
    phase = pl.program_id(0)
    j = pl.program_id(1)

    @pl.when(phase == 0)
    def _conv_and_stats():
        @pl.when(j == 0)
        def _init():
            sum_vmem[...] = jnp.zeros_like(sum_vmem)
            ssq_vmem[...] = jnp.zeros_like(ssq_vmem)

        # bf16 x bf16 -> f32 accumulation on the MXU.
        y = jnp.dot(p_ref[...], w_ref[...], preferred_element_type=jnp.float32)
        y_vmem[j] = y                                   # keep y resident in VMEM
        sum_vmem[...] += jnp.sum(y, axis=0, keepdims=True)
        ssq_vmem[...] += jnp.sum(y * y, axis=0, keepdims=True)

    @pl.when(phase == 1)
    def _bn_relu():
        @pl.when(j == 0)
        def _fold_bn():
            # Zero-padded rows contribute 0 to sum/ssq, so dividing by the
            # true row count (static) is exact.  Padded channels have
            # gamma=0 -> scale=0, shift=0 -> output 0 (sliced in wrapper).
            mean = sum_vmem[...] * inv_rows
            var = jnp.maximum(ssq_vmem[...] * inv_rows - mean * mean, 0.0)
            scale = g_ref[...] * jax.lax.rsqrt(var + EPS)
            scale_vmem[...] = scale
            shift_vmem[...] = b_ref[...] - mean * scale

        y = y_vmem[j]
        o_ref[...] = jnp.maximum(y * scale_vmem[...] + shift_vmem[...], 0.0)


# ---------------------------------------------------------------------------
# Glue: im2col, parameter folding/padding, pallas_call wiring.
# ---------------------------------------------------------------------------
def im2col_nhwc(x_nhwc):
    """(N,H,W,C) -> (N*H*W, KH*KW*C) patches for 3x3, stride 1, pad 1."""
    n, h, w, c = x_nhwc.shape
    xp = jnp.pad(x_nhwc, ((0, 0), (1, 1), (1, 1), (0, 0)))
    patches = []
    for kh in range(KH):
        for kw in range(KW):
            patches.append(xp[:, kh:kh + h, kw:kw + w, :])   # (N,H,W,C)
    p = jnp.stack(patches, axis=3)                           # (N,H,W,9,C)
    return p.reshape(n * h * w, KH * KW * c)


def pnas_basic_block_6(x_nchw, conv_w, gamma, beta):
    """x_nchw: (N, 3, H, W) float32 -> (N, 44, H, W) float32."""
    n, c, h, w = x_nchw.shape
    assert c == C_IN
    rows = n * h * w
    n_tiles = (rows + TILE_M - 1) // TILE_M
    rows_pad = n_tiles * TILE_M

    # NCHW -> NHWC, im2col, pad rows + contraction dim, cast to bf16.
    x_nhwc = jnp.transpose(x_nchw, (0, 2, 3, 1)).astype(jnp.float32)
    patches = im2col_nhwc(x_nhwc)                                   # (rows, 27)
    patches = jnp.pad(patches, ((0, rows_pad - rows), (0, K_PAD - K_RAW)))
    patches = patches.astype(jnp.bfloat16)                          # (rows_pad, 32)

    # PyTorch conv weight (Cout, Cin, Kh, Kw) -> (Kh*Kw*Cin, Cout) matching
    # the patch layout (kh outer, kw, ci inner); pad to (32, 128), bf16.
    w_mat = jnp.transpose(conv_w, (2, 3, 1, 0)).reshape(K_RAW, C_OUT)
    w_mat = jnp.pad(w_mat.astype(jnp.float32),
                    ((0, K_PAD - K_RAW), (0, C_PAD - C_OUT)))
    w_mat = w_mat.astype(jnp.bfloat16)

    gamma_p = jnp.pad(gamma.reshape(1, C_OUT).astype(jnp.float32),
                      ((0, 0), (0, C_PAD - C_OUT)))
    beta_p = jnp.pad(beta.reshape(1, C_OUT).astype(jnp.float32),
                     ((0, 0), (0, C_PAD - C_OUT)))

    grid = (2, n_tiles)   # (phase, row tiles)
    kernel = functools.partial(fused_conv_bn_relu_kernel, 1.0 / rows)

    # Phase-1 index maps pin the block index to the last phase-0 block so the
    # phase transition (and phase 1 itself) triggers no input re-DMA.
    last = n_tiles - 1

    out_rows = pl.pallas_call(
        kernel,
        out_shape=jax.ShapeDtypeStruct((rows_pad, C_PAD), jnp.float32),
        grid_spec=pltpu.PrefetchScalarGridSpec(
            num_scalar_prefetch=0,
            grid=grid,
            in_specs=[
                # Patches: tile j in phase 0; frozen (no new DMA) in phase 1.
                pl.BlockSpec((TILE_M, K_PAD),
                             lambda p, j: (j * (1 - p) + last * p, 0)),
                pl.BlockSpec((K_PAD, C_PAD), lambda p, j: (0, 0)),
                pl.BlockSpec((1, C_PAD), lambda p, j: (0, 0)),
                pl.BlockSpec((1, C_PAD), lambda p, j: (0, 0)),
            ],
            # Output only materializes in phase 1 (lane-dense 128-wide stores).
            out_specs=pl.BlockSpec((TILE_M, C_PAD), lambda p, j: (j * p, 0)),
            scratch_shapes=[
                pltpu.VMEM((n_tiles, TILE_M, C_PAD), jnp.float32),  # resident y
                pltpu.VMEM((1, C_PAD), jnp.float32),                # sum
                pltpu.VMEM((1, C_PAD), jnp.float32),                # sum of sq
                pltpu.VMEM((1, C_PAD), jnp.float32),                # BN scale
                pltpu.VMEM((1, C_PAD), jnp.float32),                # BN shift
            ],
        ),
        compiler_params=pltpu.CompilerParams(
            # Both axes carry VMEM-scratch dependencies (stats accumulator,
            # resident y), so they must stay sequential.
            dimension_semantics=("arbitrary", "arbitrary"),
            vmem_limit_bytes=64 * 1024 * 1024,
        ),
    )(patches, w_mat, gamma_p, beta_p)

    # Slice padding off: (rows_pad, 128) -> (rows, 44) -> NHWC -> NCHW.
    out = out_rows[:rows, :C_OUT].reshape(n, h, w, C_OUT)
    return jnp.transpose(out, (0, 3, 1, 2))


# ---------------------------------------------------------------------------
# Pure-JAX reference (for a self-check).
# ---------------------------------------------------------------------------
def reference(x_nchw, conv_w, gamma, beta):
    y = jax.lax.conv_general_dilated(
        x_nchw.astype(jnp.float32), conv_w.astype(jnp.float32),
        window_strides=(1, 1), padding=((1, 1), (1, 1)),
        dimension_numbers=("NCHW", "OIHW", "NCHW"))
    mean = jnp.mean(y, axis=(0, 2, 3), keepdims=True)
    var = jnp.var(y, axis=(0, 2, 3), keepdims=True)   # biased, like PyTorch BN
    yhat = (y - mean) * jax.lax.rsqrt(var + EPS)
    yhat = yhat * gamma.reshape(1, C_OUT, 1, 1) + beta.reshape(1, C_OUT, 1, 1)
    return jnp.maximum(yhat, 0.0)


if __name__ == "__main__":
    key = jax.random.PRNGKey(0)
    kx, kw = jax.random.split(key, 2)

    # Small shapes consistent with the module: N=2, Cin=3, H=W=16.
    x = jax.random.normal(kx, (2, C_IN, 16, 16), dtype=jnp.float32)

    # Deterministic synthetic parameters (no checkpoint).
    conv_w = 0.1 * jax.random.normal(kw, (C_OUT, C_IN, KH, KW), dtype=jnp.float32)
    gamma = jnp.ones((C_OUT,), dtype=jnp.float32)   # PyTorch BN default weight
    beta = jnp.zeros((C_OUT,), dtype=jnp.float32)   # PyTorch BN default bias

    out = jax.jit(pnas_basic_block_6)(x, conv_w, gamma, beta)
    out = jax.block_until_ready(out)

    ref = reference(x, conv_w, gamma, beta)
    assert out.shape == (2, C_OUT, 16, 16)
    # bf16 matmul inputs (with f32 accumulation) introduce ~1e-3-level
    # differences vs the pure-f32 reference; BN normalization keeps them
    # benign, so compare with a correspondingly relaxed tolerance.
    assert jnp.allclose(out, ref, rtol=2e-2, atol=2e-2), "mismatch vs reference"

    print("KERNEL_OK")
</pallas_src>

<mosaic_0001>
module attributes {stable_mosaic.version = 11 : i64} {
  func.func @fused_conv_bn_relu_kernel(%arg0: i32, %arg1: i32, %arg2: memref<512x32xbf16, #tpu.memory_space<vmem>>, %arg3: memref<32x128xbf16, #tpu.memory_space<vmem>>, %arg4: memref<1x128xf32, #tpu.memory_space<vmem>>, %arg5: memref<1x128xf32, #tpu.memory_space<vmem>>, %arg6: memref<512x128xf32, #tpu.memory_space<vmem>>, %arg7: memref<1x512x128xf32, #tpu.memory_space<vmem>>, %arg8: memref<1x128xf32, #tpu.memory_space<vmem>>, %arg9: memref<1x128xf32, #tpu.memory_space<vmem>>, %arg10: memref<1x128xf32, #tpu.memory_space<vmem>>, %arg11: memref<1x128xf32, #tpu.memory_space<vmem>>) attributes {dimension_semantics = [#tpu.dimension_semantics<arbitrary>, #tpu.dimension_semantics<arbitrary>], iteration_bounds = array<i64: 2, 1>, scalar_prefetch = 0 : i64, scratch_operands = 5 : i64, tpu.core_type = #tpu.core_type<tc>, window_params = [{transform_indices = @transform_0, window_bounds = array<i64: 512, 32>}, {pipeline_mode = #tpu.pipeline_mode<synchronous>, transform_indices = @transform_1, window_bounds = array<i64: 32, 128>}, {pipeline_mode = #tpu.pipeline_mode<synchronous>, transform_indices = @transform_2, window_bounds = array<i64: 1, 128>}, {pipeline_mode = #tpu.pipeline_mode<synchronous>, transform_indices = @transform_3, window_bounds = array<i64: 1, 128>}, {transform_indices = @transform_4, window_bounds = array<i64: 512, 128>}]} {
    %c0_i32 = arith.constant 0 : i32
    %0 = arith.cmpi eq, %arg0, %c0_i32 : i32
    %1 = arith.extui %0 : i1 to i32
    %c0_i32_0 = arith.constant 0 : i32
    %2 = arith.cmpi ne, %1, %c0_i32_0 : i32
    scf.if %2 {
      %c0_i32_2 = arith.constant 0 : i32
      %6 = arith.cmpi eq, %arg1, %c0_i32_2 : i32
      %7 = arith.extui %6 : i1 to i32
      %c0_i32_3 = arith.constant 0 : i32
      %8 = arith.cmpi ne, %7, %c0_i32_3 : i32
      scf.if %8 {
        %cst_19 = arith.constant 0.000000e+00 : f32
        %27 = vector.broadcast %cst_19 : f32 to vector<1x128xf32>
        %c0_20 = arith.constant 0 : index
        %c0_21 = arith.constant 0 : index
        %28 = vector.load %arg8[%c0_20, %c0_21] : memref<1x128xf32, #tpu.memory_space<vmem>>, vector<1x128xf32>
        tpu.vector_store %arg8[%c0_20, %c0_21], %27 {strides = array<i32>} : memref<1x128xf32, #tpu.memory_space<vmem>>, vector<1x128xf32>,
        %cst_22 = arith.constant 0.000000e+00 : f32
        %29 = vector.broadcast %cst_22 : f32 to vector<1x128xf32>
        %c0_23 = arith.constant 0 : index
        %c0_24 = arith.constant 0 : index
        %30 = vector.load %arg9[%c0_23, %c0_24] : memref<1x128xf32, #tpu.memory_space<vmem>>, vector<1x128xf32>
        tpu.vector_store %arg9[%c0_23, %c0_24], %29 {strides = array<i32>} : memref<1x128xf32, #tpu.memory_space<vmem>>, vector<1x128xf32>,
      } else {
      }
      %c0 = arith.constant 0 : index
      %c0_4 = arith.constant 0 : index
      %9 = vector.load %arg2[%c0, %c0_4] : memref<512x32xbf16, #tpu.memory_space<vmem>>, vector<512x32xbf16>
      %c0_5 = arith.constant 0 : index
      %c0_6 = arith.constant 0 : index
      %10 = vector.load %arg3[%c0_5, %c0_6] : memref<32x128xbf16, #tpu.memory_space<vmem>>, vector<32x128xbf16>
      %cst = arith.constant dense<0.000000e+00> : vector<512x128xf32>
      %11 = tpu.matmul %9, %10, %cst {dimension_numbers = #tpu.dot_dimension_numbers<[1], [0], [0], [1], [0, 0, 1, 1], [], []>} : vector<512x32xbf16>, vector<32x128xbf16>, vector<512x128xf32> -> vector<512x128xf32>
      %12 = arith.index_cast %arg1 : i32 to index
      %c0_7 = arith.constant 0 : index
      %c0_8 = arith.constant 0 : index
      %13 = vector.load %arg7[%12, %c0_7, %c0_8] : memref<1x512x128xf32, #tpu.memory_space<vmem>>, vector<1x512x128xf32>
      %14 = vector.shape_cast %13 : vector<1x512x128xf32> to vector<512x128xf32>
      %15 = vector.shape_cast %11 : vector<512x128xf32> to vector<1x512x128xf32>
      tpu.vector_store %arg7[%12, %c0_7, %c0_8], %15 {strides = array<i32>} : memref<1x512x128xf32, #tpu.memory_space<vmem>>, vector<1x512x128xf32>,
      %c0_9 = arith.constant 0 : index
      %c0_10 = arith.constant 0 : index
      %16 = vector.load %arg8[%c0_9, %c0_10] : memref<1x128xf32, #tpu.memory_space<vmem>>, vector<1x128xf32>
      %cst_11 = arith.constant dense<0.000000e+00> : vector<128xf32>
      %17 = vector.multi_reduction <add>, %11, %cst_11 [0] : vector<512x128xf32> to vector<128xf32>
      %18 = vector.shape_cast %17 : vector<128xf32> to vector<1x128xf32>
      %19 = arith.addf %16, %18 : vector<1x128xf32>
      %c0_12 = arith.constant 0 : index
      %c0_13 = arith.constant 0 : index
      %20 = vector.load %arg8[%c0_12, %c0_13] : memref<1x128xf32, #tpu.memory_space<vmem>>, vector<1x128xf32>
      tpu.vector_store %arg8[%c0_12, %c0_13], %19 {strides = array<i32>} : memref<1x128xf32, #tpu.memory_space<vmem>>, vector<1x128xf32>,
      %c0_14 = arith.constant 0 : index
      %c0_15 = arith.constant 0 : index
      %21 = vector.load %arg9[%c0_14, %c0_15] : memref<1x128xf32, #tpu.memory_space<vmem>>, vector<1x128xf32>
      %22 = arith.mulf %11, %11 : vector<512x128xf32>
      %cst_16 = arith.constant dense<0.000000e+00> : vector<128xf32>
      %23 = vector.multi_reduction <add>, %22, %cst_16 [0] : vector<512x128xf32> to vector<128xf32>
      %24 = vector.shape_cast %23 : vector<128xf32> to vector<1x128xf32>
      %25 = arith.addf %21, %24 : vector<1x128xf32>
      %c0_17 = arith.constant 0 : index
      %c0_18 = arith.constant 0 : index
      %26 = vector.load %arg9[%c0_17, %c0_18] : memref<1x128xf32, #tpu.memory_space<vmem>>, vector<1x128xf32>
      tpu.vector_store %arg9[%c0_17, %c0_18], %25 {strides = array<i32>} : memref<1x128xf32, #tpu.memory_space<vmem>>, vector<1x128xf32>,
    } else {
    }
    %c1_i32 = arith.constant 1 : i32
    %3 = arith.cmpi eq, %arg0, %c1_i32 : i32
    %4 = arith.extui %3 : i1 to i32
    %c0_i32_1 = arith.constant 0 : i32
    %5 = arith.cmpi ne, %4, %c0_i32_1 : i32
    scf.if %5 {
      %c0_i32_2 = arith.constant 0 : i32
      %6 = arith.cmpi eq, %arg1, %c0_i32_2 : i32
      %7 = arith.extui %6 : i1 to i32
      %c0_i32_3 = arith.constant 0 : i32
      %8 = arith.cmpi ne, %7, %c0_i32_3 : i32
      scf.if %8 {
        %c0_11 = arith.constant 0 : index
        %c0_12 = arith.constant 0 : index
        %21 = vector.load %arg8[%c0_11, %c0_12] : memref<1x128xf32, #tpu.memory_space<vmem>>, vector<1x128xf32>
        %cst_13 = arith.constant 0.001953125 : f32
        %22 = vector.broadcast %cst_13 : f32 to vector<1x128xf32>
        %23 = arith.mulf %21, %22 : vector<1x128xf32>
        %c0_14 = arith.constant 0 : index
        %c0_15 = arith.constant 0 : index
        %24 = vector.load %arg9[%c0_14, %c0_15] : memref<1x128xf32, #tpu.memory_space<vmem>>, vector<1x128xf32>
        %cst_16 = arith.constant 0.001953125 : f32
        %25 = vector.broadcast %cst_16 : f32 to vector<1x128xf32>
        %26 = arith.mulf %24, %25 : vector<1x128xf32>
        %27 = arith.mulf %23, %23 : vector<1x128xf32>
        %28 = arith.subf %26, %27 : vector<1x128xf32>
        %cst_17 = arith.constant 0.000000e+00 : f32
        %29 = vector.broadcast %cst_17 : f32 to vector<1x128xf32>
        %30 = arith.maximumf %28, %29 : vector<1x128xf32>
        %c0_18 = arith.constant 0 : index
        %c0_19 = arith.constant 0 : index
        %31 = vector.load %arg4[%c0_18, %c0_19] : memref<1x128xf32, #tpu.memory_space<vmem>>, vector<1x128xf32>
        %cst_20 = arith.constant 9.99999974E-6 : f32
        %32 = vector.broadcast %cst_20 : f32 to vector<1x128xf32>
        %33 = arith.addf %30, %32 : vector<1x128xf32>
        %34 = math.rsqrt %33 : vector<1x128xf32>
        %35 = arith.mulf %31, %34 : vector<1x128xf32>
        %c0_21 = arith.constant 0 : index
        %c0_22 = arith.constant 0 : index
        %36 = vector.load %arg10[%c0_21, %c0_22] : memref<1x128xf32, #tpu.memory_space<vmem>>, vector<1x128xf32>
        tpu.vector_store %arg10[%c0_21, %c0_22], %35 {strides = array<i32>} : memref<1x128xf32, #tpu.memory_space<vmem>>, vector<1x128xf32>,
        %c0_23 = arith.constant 0 : index
        %c0_24 = arith.constant 0 : index
        %37 = vector.load %arg5[%c0_23, %c0_24] : memref<1x128xf32, #tpu.memory_space<vmem>>, vector<1x128xf32>
        %38 = arith.mulf %23, %35 : vector<1x128xf32>
        %39 = arith.subf %37, %38 : vector<1x128xf32>
        %c0_25 = arith.constant 0 : index
        %c0_26 = arith.constant 0 : index
        %40 = vector.load %arg11[%c0_25, %c0_26] : memref<1x128xf32, #tpu.memory_space<vmem>>, vector<1x128xf32>
        tpu.vector_store %arg11[%c0_25, %c0_26], %39 {strides = array<i32>} : memref<1x128xf32, #tpu.memory_space<vmem>>, vector<1x128xf32>,
      } else {
      }
      %9 = arith.index_cast %arg1 : i32 to index
      %c0 = arith.constant 0 : index
      %c0_4 = arith.constant 0 : index
      %10 = vector.load %arg7[%9, %c0, %c0_4] : memref<1x512x128xf32, #tpu.memory_space<vmem>>, vector<1x512x128xf32>
      %11 = vector.shape_cast %10 : vector<1x512x128xf32> to vector<512x128xf32>
      %c0_5 = arith.constant 0 : index
      %c0_6 = arith.constant 0 : index
      %12 = vector.load %arg10[%c0_5, %c0_6] : memref<1x128xf32, #tpu.memory_space<vmem>>, vector<1x128xf32>
      %13 = vector.broadcast %12 : vector<1x128xf32> to vector<512x128xf32>
      %14 = arith.mulf %11, %13 : vector<512x128xf32>
      %c0_7 = arith.constant 0 : index
      %c0_8 = arith.constant 0 : index
      %15 = vector.load %arg11[%c0_7, %c0_8] : memref<1x128xf32, #tpu.memory_space<vmem>>, vector<1x128xf32>
      %16 = vector.broadcast %15 : vector<1x128xf32> to vector<512x128xf32>
      %17 = arith.addf %14, %16 : vector<512x128xf32>
      %cst = arith.constant 0.000000e+00 : f32
      %18 = vector.broadcast %cst : f32 to vector<512x128xf32>
      %19 = arith.maximumf %17, %18 : vector<512x128xf32>
      %c0_9 = arith.constant 0 : index
      %c0_10 = arith.constant 0 : index
      %20 = vector.load %arg6[%c0_9, %c0_10] : memref<512x128xf32, #tpu.memory_space<vmem>>, vector<512x128xf32>
      tpu.vector_store %arg6[%c0_9, %c0_10], %19 {strides = array<i32>} : memref<512x128xf32, #tpu.memory_space<vmem>>, vector<512x128xf32>,
    } else {
    }
    return
  }
  func.func @transform_0(%arg0: i32, %arg1: i32) -> (i32, i32) {
    %c1_i32 = arith.constant 1 : i32
    %0 = arith.subi %c1_i32, %arg0 : i32
    %1 = arith.muli %arg1, %0 : i32
    %c0_i32 = arith.constant 0 : i32
    %2 = arith.muli %c0_i32, %arg0 : i32
    %3 = arith.addi %1, %2 : i32
    %c0_i32_0 = arith.constant 0 : i32
    %c0_i32_1 = arith.constant 0 : i32
    return %3, %c0_i32_0 : i32, i32
  }
  func.func @transform_1(%arg0: i32, %arg1: i32) -> (i32, i32) {
    %c0_i32 = arith.constant 0 : i32
    %c0_i32_0 = arith.constant 0 : i32
    %c0_i32_1 = arith.constant 0 : i32
    return %c0_i32, %c0_i32_0 : i32, i32
  }
  func.func @transform_2(%arg0: i32, %arg1: i32) -> (i32, i32) {
    %c0_i32 = arith.constant 0 : i32
    %c0_i32_0 = arith.constant 0 : i32
    %c0_i32_1 = arith.constant 0 : i32
    return %c0_i32, %c0_i32_0 : i32, i32
  }
  func.func @transform_3(%arg0: i32, %arg1: i32) -> (i32, i32) {
    %c0_i32 = arith.constant 0 : i32
    %c0_i32_0 = arith.constant 0 : i32
    %c0_i32_1 = arith.constant 0 : i32
    return %c0_i32, %c0_i32_0 : i32, i32
  }
  func.func @transform_4(%arg0: i32, %arg1: i32) -> (i32, i32) {
    %0 = arith.muli %arg1, %arg0 : i32
    %c0_i32 = arith.constant 0 : i32
    %c0_i32_0 = arith.constant 0 : i32
    return %0, %c0_i32 : i32, i32
  }
}

</mosaic_0001>

<bundles_post_ra>
// kernel: pnas_basic_block_6.1
= control target key start
LH: loop header
LB: loop body
LE: loop exit
PB: predicated region body
PF: predicated region fallthrough
CT: control target
= control target key end

     0   :  { %9 = vsyncpa [#allocation8], 0  ;;  %s2443_s0 = inlined_call_operand.vmem [shape: bf16[512,32], index: 0, kind: input, shape index: {}]   ;;  %s2444_s1 = inlined_call_operand.vmem [shape: bf16[32,128], index: 1, kind: input, shape index: {}]   ;;  %s2445_s2 = inlined_call_operand.vmem [shape: f32[1,128], index: 2, kind: input, shape index: {}]   ;;  %s2446_s3 = inlined_call_operand.vmem [shape: f32[1,128], index: 3, kind: input, shape index: {}]   ;;  %s2447_s4 = inlined_call_operand.hbm [shape: f32[512,128], index: 4, kind: output, shape index: {}]  }
   0x1   :  { %11 = vsyncpa [#allocation8 + $0x1], 0  ;;  %s1930_s15 = smov 0   ;;  %s1932_s16 = smov 0  }
   0x2   :  { %s1934_s17 = smov 0  }
   0x3 LB: > { %s1588_s18 = sadd.s32 4294967295, %s1899_s17   ;;  %s1589_s19 = sadd.s32 4294967294, %s1899_s17   ;;  %s1899_s17 = sphi %s1934_s17, %s17_s17   ;;  %s1895_s16 = sphi %s1932_s16, %s2450_s16   ;;  %s1891_s15 = sphi %s1930_s15, %s2449_s15  }
   0x4   : > { %s29_s20 = sadd.s32 1, %s1895_s16  ;;  %p1593_p0 = scmp.ge.s32.totalorder %s1899_s17, 1 }
   0x5   : > { %p31_p1 = scmp.ge.s32.totalorder %s29_s20, 2  ;;  %p188_p2 = scmp.lt.s32.totalorder %s1899_s17, 3 }
   0x7   : > { %s2452_s20 = smov (%p31_p1, %s29_s20), 0  ;;  %p189_p3 = pnand %p1593_p0, %p188_p2 }
   0x8   : > { %p1594_p4 = scmp.ne.s32.totalorder (!%p189_p3), %s1891_s15, 0 }
   0x9   : > { %192 = sbr.rel (%p189_p3) target bundleno = 484 (0x1e4), region = 36 }
   0xe   : > { %232 = sbr.rel (%p1594_p4) target bundleno = 370 (0x172), region = 40 }
  0x13   : > { %v1813_v0 = vld [vmem:[%s2444_s1 + $0x8] sm:$0xff]   ;;  %v1814_v1 = vld [vmem:[%s2444_s1] sm:$0xff]   ;;  %vm479_vm0 = vcmask 261120   ;;  %v1817_v4 = vld [vmem:[%s2443_s0 + $0x10] sm:$0xff]   ;;  %v1901_v35 = vmov 0.0  }
  0x14   : > { %1702 = vmatprep.subr.bf16.mxu0 %v1813_v0  ;;  %v1815_v2 = vld [vmem:[%s2443_s0] sm:$0xff]   ;;  %1770 = vmatprep.subr.bf16.mxu1 %v1813_v0  ;;  %v1816_v3 = vld [vmem:[%s2443_s0 + $0x8] sm:$0xff]   ;;  %v1818_v5 = vld [vmem:[%s2443_s0 + $0x18] sm:$0xff]   ;;  %237 = vst [vmem:[#allocation3] sm:$0x1] %v1901_v35 }
  0x15   : > { %1703 = vmatpush3.bf16.msra.mxu0 %v1813_v0  ;;  %1772 = vmatpush3.bf16.msra.mxu1 %v1813_v0  ;;  %v1819_v6 = vld [vmem:[%s2443_s0 + $0x20] sm:$0xff]   ;;  %v1832_v8 = vld [vmem:[%s2443_s0 + $0x88] sm:$0xff]   ;;  %v1833_v9 = vld [vmem:[%s2443_s0 + $0x90] sm:$0xff]   ;;  %238 = vst [vmem:[#allocation4] sm:$0x1] %v1901_v35 }
  0x16   : > { %1704 = vmatprep.subr.bf16.mxu0 %v1814_v1  ;;  %1706 = vmatprep.mubr.msk.bf16.mxu0 %vm479_vm0, %v1815_v2  ;;  %v1831_v7 = vld [vmem:[%s2443_s0 + $0x80] sm:$0xff]   ;;  %v1820_v10 = vld [vmem:[%s2443_s0 + $0x28] sm:$0xff]   ;;  %v1821_v11 = vld [vmem:[%s2443_s0 + $0x30] sm:$0xff]  }
  0x17   : > { %1771 = vmatprep.subr.bf16.mxu1 %v1814_v1  ;;  %1738 = vmatprep.mubr.msk.bf16.mxu1 %vm479_vm0, %v1831_v7  ;;  %v1834_v12 = vld [vmem:[%s2443_s0 + $0x98] sm:$0xff]   ;;  %v1835_v13 = vld [vmem:[%s2443_s0 + $0xa0] sm:$0xff]   ;;  %v1836_v16 = vld [vmem:[%s2443_s0 + $0xa8] sm:$0xff]  }
  0x18   : > { %v1822_v14 = vld [vmem:[%s2443_s0 + $0x38] sm:$0xff]   ;;  %v1823_v15 = vld [vmem:[%s2443_s0 + $0x40] sm:$0xff]   ;;  %v1837_v17 = vld [vmem:[%s2443_s0 + $0xb0] sm:$0xff]  }
  0x19   : > { %1705 = vmatpush3.bf16.msra.mxu0 %v1814_v1  ;;  %1773 = vmatpush3.bf16.msra.mxu1 %v1814_v1  ;;  %v1824_v18 = vld [vmem:[%s2443_s0 + $0x48] sm:$0xff]   ;;  %v1825_v19 = vld [vmem:[%s2443_s0 + $0x50] sm:$0xff]   ;;  %v1838_v20 = vld [vmem:[%s2443_s0 + $0xb8] sm:$0xff]  }
  0x1a   : > { %v1839_v21 = vld [vmem:[%s2443_s0 + $0xc0] sm:$0xff]   ;;  %v1826_v22 = vld [vmem:[%s2443_s0 + $0x58] sm:$0xff]   ;;  %v1840_v24 = vld [vmem:[%s2443_s0 + $0xc8] sm:$0xff]  }
  0x1b   : > { %v1827_v23 = vld [vmem:[%s2443_s0 + $0x60] sm:$0xff]   ;;  %v1841_v25 = vld [vmem:[%s2443_s0 + $0xd0] sm:$0xff]   ;;  %v1828_v26 = vld [vmem:[%s2443_s0 + $0x68] sm:$0xff]  }
  0x1c   : > { %1707 = vmatmul.mubr.msk.bf16.vlgmr.msra.gmra.mxu0 %vm479_vm0, %v1816_v3  ;;  %1739 = vmatmul.mubr.msk.bf16.vlgmr.msra.gmra.mxu1 %vm479_vm0, %v1832_v8  ;;  %v1829_v27 = vld [vmem:[%s2443_s0 + $0x70] sm:$0xff]   ;;  %v1842_v28 = vld [vmem:[%s2443_s0 + $0xd8] sm:$0xff]   ;;  %v1843_v29 = vld [vmem:[%s2443_s0 + $0xe0] sm:$0xff]  }
  0x1d   : > { %1710 = vmatprep.mubr.msk.bf16.mxu0 %vm479_vm0, %v1817_v4  ;;  %1742 = vmatprep.mubr.msk.bf16.mxu1 %vm479_vm0, %v1833_v9  ;;  %v1830_v30 = vld [vmem:[%s2443_s0 + $0x78] sm:$0xff]   ;;  %v1844_v31 = vld [vmem:[%s2443_s0 + $0xe8] sm:$0xff]   ;;  %v1845_v32 = vld [vmem:[%s2443_s0 + $0xf0] sm:$0xff]  }
  0x1e   : > { %v1846_v33 = vld [vmem:[%s2443_s0 + $0xf8] sm:$0xff]  }
  0x24   : > { %1711 = vmatmul.mubr.msk.bf16.gmra.mxu0 %vm479_vm0, %v1818_v5  ;;  %1743 = vmatmul.mubr.msk.bf16.gmra.mxu1 %vm479_vm0, %v1834_v12 }
  0x25   : > { %1714 = vmatprep.mubr.msk.bf16.mxu0 %vm479_vm0, %v1819_v6  ;;  %1746 = vmatprep.mubr.msk.bf16.mxu1 %vm479_vm0, %v1835_v13 }
  0x2c   : > { %1715 = vmatmul.mubr.msk.bf16.gmra.mxu0 %vm479_vm0, %v1820_v10  ;;  %1747 = vmatmul.mubr.msk.bf16.gmra.mxu1 %vm479_vm0, %v1836_v16 }
  0x2d   : > { %1718 = vmatprep.mubr.msk.bf16.mxu0 %vm479_vm0, %v1821_v11  ;;  %1750 = vmatprep.mubr.msk.bf16.mxu1 %vm479_vm0, %v1837_v17 }
  0x34   : > { %1719 = vmatmul.mubr.msk.bf16.gmra.mxu0 %vm479_vm0, %v1822_v14  ;;  %1751 = vmatmul.mubr.msk.bf16.gmra.mxu1 %vm479_vm0, %v1838_v20 }
  0x35   : > { %1722 = vmatprep.mubr.msk.bf16.mxu0 %vm479_vm0, %v1823_v15  ;;  %1754 = vmatprep.mubr.msk.bf16.mxu1 %vm479_vm0, %v1839_v21 }
  0x3c   : > { %1723 = vmatmul.mubr.msk.bf16.gmra.mxu0 %vm479_vm0, %v1824_v18  ;;  %1755 = vmatmul.mubr.msk.bf16.gmra.mxu1 %vm479_vm0, %v1840_v24 }
  0x3d   : > { %1726 = vmatprep.mubr.msk.bf16.mxu0 %vm479_vm0, %v1825_v19  ;;  %1758 = vmatprep.mubr.msk.bf16.mxu1 %vm479_vm0, %v1841_v25 }
  0x44   : > { %1727 = vmatmul.mubr.msk.bf16.gmra.mxu0 %vm479_vm0, %v1826_v22  ;;  %1759 = vmatmul.mubr.msk.bf16.gmra.mxu1 %vm479_vm0, %v1842_v28 }
  0x45   : > { %1730 = vmatprep.mubr.msk.bf16.mxu0 %vm479_vm0, %v1827_v23  ;;  %1762 = vmatprep.mubr.msk.bf16.mxu1 %vm479_vm0, %v1843_v29 }
  0x4c   : > { %1731 = vmatmul.mubr.msk.bf16.gmra.mxu0 %vm479_vm0, %v1828_v26  ;;  %1763 = vmatmul.mubr.msk.bf16.gmra.mxu1 %vm479_vm0, %v1844_v31 }
  0x4d   : > { %1734 = vmatprep.mubr.msk.bf16.mxu0 %vm479_vm0, %v1829_v27  ;;  %1766 = vmatprep.mubr.msk.bf16.mxu1 %vm479_vm0, %v1845_v32 }
  0x54   : > { %1735 = vmatmul.mubr.msk.bf16.gmra.mxu0 %vm479_vm0, %v1830_v30  ;;  %1767 = vmatmul.mubr.msk.bf16.gmra.mxu1 %vm479_vm0, %v1846_v33 }
  0xdc   : > { %v1708_v34 = vpop.f32.mrf.mxu0  ;;  %v2087_v50 = vpop.f32.mrf.mxu1 }
  0xdd   : > { %869 = vst [vmem:[#allocation2 + $0xd8] sm:$0xff] %v1708_v34  ;;  %v1006_v43 = vmul.f32 %v1708_v34, %v1708_v34  ;;  %901 = vst [vmem:[#allocation2 + $0x100] sm:$0xff] %v2087_v50 }
  0xde   : > { %v610_v36 = vpop.f32.mrf.mxu0  ;;  %v2090_v55 = vpop.f32.mrf.mxu1 }
  0xdf   : > { %867 = vst [vmem:[#allocation2 + $0xb0] sm:$0xff] %v610_v36  ;;  %v1004_v39 = vmul.f32 %v610_v36, %v610_v36  ;;  %899 = vst [vmem:[#allocation2 + $0x148] sm:$0xff] %v2090_v55 }
  0xe0   : > { %v1709_v37 = vpop.f32.mrf.mxu0  ;;  %v2093_v60 = vpop.f32.mrf.mxu1 }
  0xe1   : > { %870 = vst [vmem:[#allocation2 + $0x18] sm:$0xff] %v1709_v37  ;;  %v1007_v47 = vmul.f32 %v1709_v37, %v1709_v37  ;;  %902 = vst [vmem:[#allocation2 + $0xc8] sm:$0xff] %v2093_v60 }
  0xe2   : > { %v613_v38 = vpop.f32.mrf.mxu0  ;;  %v2096_v1 = vpop.f32.mrf.mxu1 }
  0xe3   : > { %868 = vst [vmem:[#allocation2 + $0x1b0] sm:$0xff] %v613_v38  ;;  %v932_v40 = vadd.f32 %v613_v38, %v610_v36  ;;  %v1005_v41 = vmul.f32 %v613_v38, %v613_v38  ;;  %900 = vst [vmem:[#allocation2 + $0x1d0] sm:$0xff] %v2096_v1 }
  0xe4   : > { %v1712_v42 = vpop.f32.mrf.mxu0  ;;  %v2099_v6 = vpop.f32.mrf.mxu1 }
  0xe5   : > { %v933_v44 = vadd.f32 %v1708_v34, %v932_v40  ;;  %v1068_v45 = vadd.f32 %v1005_v41, %v1004_v39  ;;  %873 = vst [vmem:[#allocation2 + $0x130] sm:$0xff] %v1712_v42  ;;  %v1010_v62 = vmul.f32 %v1712_v42, %v1712_v42  ;;  %905 = vst [vmem:[#allocation2 + $0x20] sm:$0xff] %v2099_v6 }
  0xe6   : > { %v626_v46 = vpop.f32.mrf.mxu0  ;;  %v2102_v11 = vpop.f32.mrf.mxu1 }
  0xe7   : > { %v1069_v48 = vadd.f32 %v1068_v45, %v1006_v43  ;;  %871 = vst [vmem:[#allocation2 + $0x50] sm:$0xff] %v626_v46  ;;  %v934_v49 = vadd.f32 %v1709_v37, %v933_v44  ;;  %v1008_v53 = vmul.f32 %v626_v46, %v626_v46  ;;  %903 = vst [vmem:[#allocation2 + $0x40] sm:$0xff] %v2102_v11 }
  0xe8   : > { %v1713_v51 = vpop.f32.mrf.mxu0  ;;  %v2105_v16 = vpop.f32.mrf.mxu1 }
  0xe9   : > { %v935_v52 = vadd.f32 %v934_v49, %v626_v46  ;;  %v1070_v54 = vadd.f32 %v1069_v48, %v1007_v47  ;;  %874 = vst [vmem:[#allocation2 + $0x48] sm:$0xff] %v1713_v51  ;;  %v1011_v3 = vmul.f32 %v1713_v51, %v1713_v51  ;;  %906 = vst [vmem:[#allocation2 + $0x128] sm:$0xff] %v2105_v16 }
  0xea   : > { %v629_v56 = vpop.f32.mrf.mxu0  ;;  %v2108_v21 = vpop.f32.mrf.mxu1 }
  0xeb   : > { %v1071_v57 = vadd.f32 %v1070_v54, %v1008_v53  ;;  %872 = vst [vmem:[#allocation2 + $0x168] sm:$0xff] %v629_v56  ;;  %v936_v58 = vadd.f32 %v935_v52, %v629_v56  ;;  %v1009_v59 = vmul.f32 %v629_v56, %v629_v56  ;;  %904 = vst [vmem:[#allocation2 + $0x1f8] sm:$0xff] %v2108_v21 }
  0xec   : > { %v1716_v61 = vpop.f32.mrf.mxu0  ;;  %v2111_v26 = vpop.f32.mrf.mxu1 }
  0xed   : > { %v937_v63 = vadd.f32 %v1712_v42, %v936_v58  ;;  %v1072_v0 = vadd.f32 %v1071_v57, %v1009_v59  ;;  %877 = vst [vmem:[#allocation2 + $0x118] sm:$0xff] %v1716_v61  ;;  %v1014_v18 = vmul.f32 %v1716_v61, %v1716_v61  ;;  %909 = vst [vmem:[#allocation2 + $0xe8] sm:$0xff] %v2111_v26 }
  0xee   : > { %v642_v2 = vpop.f32.mrf.mxu0  ;;  %v2114_v31 = vpop.f32.mrf.mxu1 }
  0xef   : > { %v1073_v4 = vadd.f32 %v1072_v0, %v1010_v62  ;;  %875 = vst [vmem:[#allocation2 + $0x180] sm:$0xff] %v642_v2  ;;  %v938_v5 = vadd.f32 %v1713_v51, %v937_v63  ;;  %v1012_v9 = vmul.f32 %v642_v2, %v642_v2  ;;  %907 = vst [vmem:[#allocation2 + $0x1a0] sm:$0xff] %v2114_v31 }
  0xf0   : > { %v1717_v7 = vpop.f32.mrf.mxu0  ;;  %v2117_v36 = vpop.f32.mrf.mxu1 }
  0xf1   : > { %v939_v8 = vadd.f32 %v938_v5, %v642_v2  ;;  %v1074_v10 = vadd.f32 %v1073_v4, %v1011_v3  ;;  %878 = vst [vmem:[#allocation2 + $0x98] sm:$0xff] %v1717_v7  ;;  %v1015_v23 = vmul.f32 %v1717_v7, %v1717_v7  ;;  %910 = vst [vmem:[#allocation2 + $0x78] sm:$0xff] %v2117_v36 }
  0xf2   : > { %v645_v12 = vpop.f32.mrf.mxu0  ;;  %v2120_v41 = vpop.f32.mrf.mxu1 }
  0xf3   : > { %v1075_v13 = vadd.f32 %v1074_v10, %v1012_v9  ;;  %876 = vst [vmem:[#allocation2 + $0x110] sm:$0xff] %v645_v12  ;;  %v940_v14 = vadd.f32 %v939_v8, %v645_v12  ;;  %v1013_v15 = vmul.f32 %v645_v12, %v645_v12  ;;  %908 = vst [vmem:[#allocation2 + $0x1f0] sm:$0xff] %v2120_v41 }
  0xf4   : > { %v1720_v17 = vpop.f32.mrf.mxu0  ;;  %v2123_v46 = vpop.f32.mrf.mxu1 }
  0xf5   : > { %v941_v19 = vadd.f32 %v1716_v61, %v940_v14  ;;  %v1076_v20 = vadd.f32 %v1075_v13, %v1013_v15  ;;  %881 = vst [vmem:[#allocation2 + $0x108] sm:$0xff] %v1720_v17  ;;  %v1018_v38 = vmul.f32 %v1720_v17, %v1720_v17  ;;  %913 = vst [vmem:[#allocation2 + $0x1d8] sm:$0xff] %v2123_v46 }
  0xf6   : > { %v658_v22 = vpop.f32.mrf.mxu0  ;;  %v2126_v52 = vpop.f32.mrf.mxu1 }
  0xf7   : > { %v1077_v24 = vadd.f32 %v1076_v20, %v1014_v18  ;;  %879 = vst [vmem:[#allocation2 + $0x120] sm:$0xff] %v658_v22  ;;  %v942_v25 = vadd.f32 %v1717_v7, %v941_v19  ;;  %v1016_v29 = vmul.f32 %v658_v22, %v658_v22  ;;  %911 = vst [vmem:[#allocation2 + $0x70] sm:$0xff] %v2126_v52 }
  0xf8   : > { %v1721_v27 = vpop.f32.mrf.mxu0  ;;  %v2129_v58 = vpop.f32.mrf.mxu1 }
  0xf9   : > { %v943_v28 = vadd.f32 %v942_v25, %v658_v22  ;;  %v1078_v30 = vadd.f32 %v1077_v24, %v1015_v23  ;;  %882 = vst [vmem:[#allocation2 + $0x60] sm:$0xff] %v1721_v27  ;;  %v1019_v43 = vmul.f32 %v1721_v27, %v1721_v27  ;;  %914 = vst [vmem:[#allocation2 + $0xd0] sm:$0xff] %v2129_v58 }
  0xfa   : > { %v661_v32 = vpop.f32.mrf.mxu0  ;;  %v2132_v0 = vpop.f32.mrf.mxu1 }
  0xfb   : > { %v1079_v33 = vadd.f32 %v1078_v30, %v1016_v29  ;;  %880 = vst [vmem:[#allocation2 + $0x150] sm:$0xff] %v661_v32  ;;  %v944_v34 = vadd.f32 %v943_v28, %v661_v32  ;;  %v1017_v35 = vmul.f32 %v661_v32, %v661_v32  ;;  %912 = vst [vmem:[#allocation2 + $0x90] sm:$0xff] %v2132_v0 }
  0xfc   : > { %v1724_v37 = vpop.f32.mrf.mxu0  ;;  %v2135_v7 = vpop.f32.mrf.mxu1 }
  0xfd   : > { %v945_v39 = vadd.f32 %v1720_v17, %v944_v34  ;;  %v1080_v40 = vadd.f32 %v1079_v33, %v1017_v35  ;;  %885 = vst [vmem:[#allocation2 + $0x138] sm:$0xff] %v1724_v37  ;;  %v1022_v61 = vmul.f32 %v1724_v37, %v1724_v37  ;;  %917 = vst [vmem:[#allocation2 + $0xa8] sm:$0xff] %v2135_v7 }
  0xfe   : > { %v674_v42 = vpop.f32.mrf.mxu0  ;;  %v2138_v13 = vpop.f32.mrf.mxu1 }
  0xff   : > { %v1081_v44 = vadd.f32 %v1080_v40, %v1018_v38  ;;  %883 = vst [vmem:[#allocation2 + $0xe0] sm:$0xff] %v674_v42  ;;  %v946_v45 = vadd.f32 %v1721_v27, %v945_v39  ;;  %v1020_v49 = vmul.f32 %v674_v42, %v674_v42  ;;  %915 = vst [vmem:[#allocation2 + $0xb8] sm:$0xff] %v2138_v13 }
 0x100   : > { %v1725_v47 = vpop.f32.mrf.mxu0  ;;  %v2141_v19 = vpop.f32.mrf.mxu1 }
 0x101   : > { %v947_v48 = vadd.f32 %v946_v45, %v674_v42  ;;  %v1082_v51 = vadd.f32 %v1081_v44, %v1019_v43  ;;  %886 = vst [vmem:[#allocation2 + $0x140] sm:$0xff] %v1725_v47  ;;  %v1023_v3 = vmul.f32 %v1725_v47, %v1725_v47  ;;  %918 = vst [vmem:[#allocation2 + $0x1c8] sm:$0xff] %v2141_v19 }
 0x102   : > { %v677_v53 = vpop.f32.mrf.mxu0  ;;  %v2144_v25 = vpop.f32.mrf.mxu1 }
 0x103   : > { %v1083_v54 = vadd.f32 %v1082_v51, %v1020_v49  ;;  %884 = vst [vmem:[#allocation2 + $0x188] sm:$0xff] %v677_v53  ;;  %v948_v56 = vadd.f32 %v947_v48, %v677_v53  ;;  %v1021_v57 = vmul.f32 %v677_v53, %v677_v53  ;;  %916 = vst [vmem:[#allocation2 + $0x88] sm:$0xff] %v2144_v25 }
 0x104   : > { %v1728_v59 = vpop.f32.mrf.mxu0  ;;  %v2147_v32 = vpop.f32.mrf.mxu1 }
 0x105   : > { %v949_v62 = vadd.f32 %v1724_v37, %v948_v56  ;;  %v1084_v63 = vadd.f32 %v1083_v54, %v1021_v57  ;;  %889 = vst [vmem:[#allocation2 + $0x1b8] sm:$0xff] %v1728_v59  ;;  %v1026_v22 = vmul.f32 %v1728_v59, %v1728_v59  ;;  %921 = vst [vmem:[#allocation2 + $0x68] sm:$0xff] %v2147_v32 }
 0x106   : > { %v690_v2 = vpop.f32.mrf.mxu0  ;;  %v2150_v38 = vpop.f32.mrf.mxu1 }
 0x107   : > { %v1085_v4 = vadd.f32 %v1084_v63, %v1022_v61  ;;  %887 = vst [vmem:[#allocation2 + $0x80] sm:$0xff] %v690_v2  ;;  %v950_v5 = vadd.f32 %v1725_v47, %v949_v62  ;;  %v1024_v10 = vmul.f32 %v690_v2, %v690_v2  ;;  %919 = vst [vmem:[#allocation2 + $0x170] sm:$0xff] %v2150_v38 }
 0x108   : > { %v1729_v8 = vpop.f32.mrf.mxu0  ;;  %v2153_v44 = vpop.f32.mrf.mxu1 }
 0x109   : > { %v951_v9 = vadd.f32 %v950_v5, %v690_v2  ;;  %v1086_v12 = vadd.f32 %v1085_v4, %v1023_v3  ;;  %890 = vst [vmem:[#allocation2 + $0x28] sm:$0xff] %v1729_v8  ;;  %v1027_v28 = vmul.f32 %v1729_v8, %v1729_v8  ;;  %922 = vst [vmem:[#allocation2 + $0x190] sm:$0xff] %v2153_v44 }
 0x10a   : > { %v693_v14 = vpop.f32.mrf.mxu0  ;;  %v2156_v51 = vpop.f32.mrf.mxu1 }
 0x10b   : > { %v1087_v15 = vadd.f32 %v1086_v12, %v1024_v10  ;;  %888 = vst [vmem:[#allocation2 + $0x1a8] sm:$0xff] %v693_v14  ;;  %v952_v17 = vadd.f32 %v951_v9, %v693_v14  ;;  %v1025_v18 = vmul.f32 %v693_v14, %v693_v14  ;;  %920 = vst [vmem:[#allocation2 + $0x178] sm:$0xff] %v2156_v51 }
 0x10c   : > { %v1732_v20 = vpop.f32.mrf.mxu0 }
 0x10d   : > { %v953_v23 = vadd.f32 %v1728_v59, %v952_v17  ;;  %v1088_v24 = vadd.f32 %v1087_v15, %v1025_v18  ;;  %893 = vst [vmem:[#allocation2 + $0x160] sm:$0xff] %v1732_v20  ;;  %v1030_v47 = vmul.f32 %v1732_v20, %v1732_v20  ;;  %v2159_v59 = vpop.f32.mrf.mxu1 }
 0x10e   : > { %v706_v27 = vpop.f32.mrf.mxu0  ;;  %925 = vst [vmem:[#allocation2 + $0xc0] sm:$0xff] %v2159_v59 }
 0x10f   : > { %v1089_v29 = vadd.f32 %v1088_v24, %v1026_v22  ;;  %891 = vst [vmem:[#allocation2 + $0x1e8] sm:$0xff] %v706_v27  ;;  %v954_v30 = vadd.f32 %v1729_v8, %v953_v23  ;;  %v1028_v35 = vmul.f32 %v706_v27, %v706_v27  ;;  %v2162_v3 = vpop.f32.mrf.mxu1  ;;  %v1036_v24 = vmul.f32 %v2090_v55, %v2090_v55 }
 0x110   : > { %v1733_v33 = vpop.f32.mrf.mxu0  ;;  %923 = vst [vmem:[#allocation2 + $0x198] sm:$0xff] %v2162_v3 }
 0x111   : > { %v955_v34 = vadd.f32 %v954_v30, %v706_v27  ;;  %v1090_v37 = vadd.f32 %v1089_v29, %v1027_v28  ;;  %894 = vst [vmem:[#allocation2 + $0x30] sm:$0xff] %v1733_v33  ;;  %v1031_v54 = vmul.f32 %v1733_v33, %v1733_v33  ;;  %v2165_v10 = vpop.f32.mrf.mxu1 }
 0x112   : > { %v709_v39 = vpop.f32.mrf.mxu0  ;;  %926 = vst [vmem:[#allocation2 + $0x1c0] sm:$0xff] %v2165_v10 }
 0x113   : > { %v1091_v40 = vadd.f32 %v1090_v37, %v1028_v35  ;;  %892 = vst [vmem:[#allocation2 + $0xf8] sm:$0xff] %v709_v39  ;;  %v956_v42 = vadd.f32 %v955_v34, %v709_v39  ;;  %v1029_v43 = vmul.f32 %v709_v39, %v709_v39  ;;  %v2168_v17 = vpop.f32.mrf.mxu1  ;;  %v1038_v37 = vmul.f32 %v2087_v50, %v2087_v50 }
 0x114   : > { %v1736_v45 = vpop.f32.mrf.mxu0  ;;  %924 = vst [vmem:[#allocation2 + $0x38] sm:$0xff] %v2168_v17 }
 0x115   : > { %v957_v48 = vadd.f32 %v1732_v20, %v956_v42  ;;  %v1092_v49 = vadd.f32 %v1091_v40, %v1029_v43  ;;  %897 = vst [vmem:[#allocation2 + $0xf0] sm:$0xff] %v1736_v45  ;;  %v1034_v12 = vmul.f32 %v1736_v45, %v1736_v45  ;;  %v2171_v23 = vpop.f32.mrf.mxu1  ;;  %v1039_v42 = vmul.f32 %v2093_v60, %v2093_v60 }
 0x116   : > { %v722_v53 = vpop.f32.mrf.mxu0  ;;  %929 = vst [vmem:[#allocation2 + $0x58] sm:$0xff] %v2171_v23 }
 0x117   : > { %v1093_v56 = vadd.f32 %v1092_v49, %v1030_v47  ;;  %895 = vst [vmem:[#allocation2 + $0x1e0] sm:$0xff] %v722_v53  ;;  %v958_v57 = vadd.f32 %v1733_v33, %v957_v48  ;;  %v1032_v63 = vmul.f32 %v722_v53, %v722_v53  ;;  %v2177_v29 = vpop.f32.mrf.mxu1  ;;  %v1037_v33 = vmul.f32 %v2096_v1, %v2096_v1 }
 0x118   : > { %v1737_v61 = vpop.f32.mrf.mxu0  ;;  %927 = vst [vmem:[#allocation2 + $0x158] sm:$0xff] %v2177_v29  ;;  %v1040_v47 = vmul.f32 %v2102_v11, %v2102_v11 }
 0x119   : > { %v959_v62 = vadd.f32 %v958_v57, %v722_v53  ;;  %v1094_v2 = vadd.f32 %v1093_v56, %v1031_v54  ;;  %898 = vst [vmem:[#allocation2 + $0x8] sm:$0xff] %v1737_v61  ;;  %v1035_v18 = vmul.f32 %v1737_v61, %v1737_v61  ;;  %v2183_v35 = vpop.f32.mrf.mxu1  ;;  %v1041_v53 = vmul.f32 %v2108_v21, %v2108_v21 }
 0x11a   : > { %v725_v4 = vpop.f32.mrf.mxu0  ;;  %930 = vst [vmem:[#allocation2 + $0xa0] sm:$0xff] %v2183_v35  ;;  %v1042_v54 = vmul.f32 %v2099_v6, %v2099_v6 }
 0x11b   : > { %v1095_v5 = vadd.f32 %v1094_v2, %v1032_v63  ;;  %896 = vst [vmem:[#allocation2] sm:$0xff] %v725_v4  ;;  %v960_v8 = vadd.f32 %v959_v62, %v725_v4  ;;  %v1033_v9 = vmul.f32 %v725_v4, %v725_v4  ;;  %v2189_v40 = vpop.f32.mrf.mxu1  ;;  %v1044_v63 = vmul.f32 %v2114_v31, %v2114_v31 }
 0x11c   : > { %928 = vst [vmem:[#allocation2 + $0x10] sm:$0xff] %v2189_v40 }
 0x11d   : > { %v961_v14 = vadd.f32 %v1736_v45, %v960_v8  ;;  %v1096_v15 = vadd.f32 %v1095_v5, %v1033_v9  ;;  %v1045_v5 = vmul.f32 %v2120_v41, %v2120_v41 }
 0x11f   : > { %v962_v20 = vadd.f32 %v1737_v61, %v961_v14  ;;  %v1097_v22 = vadd.f32 %v1096_v15, %v1034_v12  ;;  %v1048_v15 = vmul.f32 %v2126_v52, %v2126_v52 }
 0x121   : > { %v1098_v27 = vadd.f32 %v1097_v22, %v1035_v18  ;;  %v963_v28 = vadd.f32 %v962_v20, %v2090_v55  ;;  %v1049_v22 = vmul.f32 %v2132_v0, %v2132_v0 }
 0x123   : > { %v964_v30 = vadd.f32 %v963_v28, %v2096_v1  ;;  %v1099_v34 = vadd.f32 %v1098_v27, %v1036_v24 }
 0x125   : > { %v965_v39 = vadd.f32 %v2087_v50, %v964_v30  ;;  %v1100_v55 = vadd.f32 %v1099_v34, %v1037_v33  ;;  %v1052_v33 = vmul.f32 %v2138_v13, %v2138_v13 }
 0x127   : > { %v1101_v43 = vadd.f32 %v1100_v55, %v1038_v37  ;;  %v966_v1 = vadd.f32 %v2093_v60, %v965_v39  ;;  %v1043_v60 = vmul.f32 %v2105_v16, %v2105_v16  ;;  %v1053_v39 = vmul.f32 %v2144_v25, %v2144_v25 }
 0x129   : > { %v967_v45 = vadd.f32 %v966_v1, %v2102_v11  ;;  %v1102_v48 = vadd.f32 %v1101_v43, %v1039_v42 }
 0x12b   : > { %v1103_v49 = vadd.f32 %v1102_v48, %v1040_v47  ;;  %v968_v50 = vadd.f32 %v967_v45, %v2108_v21  ;;  %v1056_v45 = vmul.f32 %v2150_v38, %v2150_v38 }
 0x12d   : > { %v969_v56 = vadd.f32 %v2099_v6, %v968_v50  ;;  %v1104_v57 = vadd.f32 %v1103_v49, %v1041_v53  ;;  %v1046_v6 = vmul.f32 %v2111_v26, %v2111_v26  ;;  %v1057_v49 = vmul.f32 %v2156_v51, %v2156_v51 }
 0x12f   : > { %v1105_v61 = vadd.f32 %v1104_v57, %v1042_v54  ;;  %v970_v62 = vadd.f32 %v2105_v16, %v969_v56  ;;  %v1047_v16 = vmul.f32 %v2117_v36, %v2117_v36  ;;  %v1060_v57 = vmul.f32 %v2162_v3, %v2162_v3 }
 0x131   : > { %v971_v11 = vadd.f32 %v970_v62, %v2114_v31  ;;  %v1106_v2 = vadd.f32 %v1105_v61, %v1043_v60  ;;  %v1061_v62 = vmul.f32 %v2168_v17, %v2168_v17 }
 0x133   : > { %v1107_v4 = vadd.f32 %v1106_v2, %v1044_v63  ;;  %v972_v21 = vadd.f32 %v971_v11, %v2120_v41 }
 0x135   : > { %v973_v8 = vadd.f32 %v2111_v26, %v972_v21  ;;  %v1108_v9 = vadd.f32 %v1107_v4, %v1045_v5  ;;  %v1050_v26 = vmul.f32 %v2123_v46, %v2123_v46  ;;  %v1064_v21 = vmul.f32 %v2177_v29, %v2177_v29 }
 0x137   : > { %v1109_v12 = vadd.f32 %v1108_v9, %v1046_v6  ;;  %v974_v14 = vadd.f32 %v2117_v36, %v973_v8  ;;  %v1051_v36 = vmul.f32 %v2129_v58, %v2129_v58  ;;  %v1065_v8 = vmul.f32 %v2189_v40, %v2189_v40 }
 0x139   : > { %v975_v31 = vadd.f32 %v974_v14, %v2126_v52  ;;  %v1110_v18 = vadd.f32 %v1109_v12, %v1047_v16 }
 0x13b   : > { %v1111_v20 = vadd.f32 %v1110_v18, %v1048_v15  ;;  %v976_v41 = vadd.f32 %v975_v31, %v2132_v0 }
 0x13d   : > { %v977_v24 = vadd.f32 %v2123_v46, %v976_v41  ;;  %v1112_v27 = vadd.f32 %v1111_v20, %v1049_v22  ;;  %v1054_v46 = vmul.f32 %v2135_v7, %v2135_v7 }
 0x13f   : > { %v1113_v28 = vadd.f32 %v1112_v27, %v1050_v26  ;;  %v978_v30 = vadd.f32 %v2129_v58, %v977_v24  ;;  %v1055_v58 = vmul.f32 %v2141_v19, %v2141_v19  ;;  %v931_v27 = vld [vmem:[#allocation3] sm:$0x1] }
 0x141   : > { %v979_v52 = vadd.f32 %v978_v30, %v2138_v13  ;;  %v1114_v34 = vadd.f32 %v1113_v28, %v1051_v36  ;;  %v1003_v28 = vld [vmem:[#allocation4] sm:$0x1] }
 0x143   : > { %v1115_v37 = vadd.f32 %v1114_v34, %v1052_v33  ;;  %v980_v0 = vadd.f32 %v979_v52, %v2144_v25 }
 0x145   : > { %v981_v55 = vadd.f32 %v2135_v7, %v980_v0  ;;  %v1116_v42 = vadd.f32 %v1115_v37, %v1053_v39  ;;  %v1058_v7 = vmul.f32 %v2147_v32, %v2147_v32 }
 0x147   : > { %v1117_v43 = vadd.f32 %v1116_v42, %v1054_v46  ;;  %v982_v1 = vadd.f32 %v2141_v19, %v981_v55  ;;  %v1059_v19 = vmul.f32 %v2153_v44, %v2153_v44 }
 0x149   : > { %v983_v13 = vadd.f32 %v982_v1, %v2150_v38  ;;  %v1118_v47 = vadd.f32 %v1117_v43, %v1055_v58 }
 0x14b   : > { %v1119_v48 = vadd.f32 %v1118_v47, %v1056_v45  ;;  %v984_v25 = vadd.f32 %v983_v13, %v2156_v51 }
 0x14d   : > { %v985_v50 = vadd.f32 %v2147_v32, %v984_v25  ;;  %v1120_v53 = vadd.f32 %v1119_v48, %v1057_v49  ;;  %v1062_v32 = vmul.f32 %v2159_v59, %v2159_v59 }
 0x14f   : > { %v1121_v54 = vadd.f32 %v1120_v53, %v1058_v7  ;;  %v986_v56 = vadd.f32 %v2153_v44, %v985_v50  ;;  %v1063_v44 = vmul.f32 %v2165_v10, %v2165_v10 }
 0x151   : > { %v987_v38 = vadd.f32 %v986_v56, %v2162_v3  ;;  %v1122_v60 = vadd.f32 %v1121_v54, %v1059_v19 }
 0x153   : > { %v1123_v61 = vadd.f32 %v1122_v60, %v1060_v57  ;;  %v988_v51 = vadd.f32 %v987_v38, %v2168_v17 }
 0x155   : > { %v989_v11 = vadd.f32 %v2159_v59, %v988_v51  ;;  %v1124_v63 = vadd.f32 %v1123_v61, %v1061_v62  ;;  %v1066_v59 = vmul.f32 %v2171_v23, %v2171_v23 }
 0x157   : > { %v1125_v2 = vadd.f32 %v1124_v63, %v1062_v32  ;;  %v990_v4 = vadd.f32 %v2165_v10, %v989_v11  ;;  %v1067_v10 = vmul.f32 %v2183_v35, %v2183_v35 }
 0x159   : > { %v991_v3 = vadd.f32 %v990_v4, %v2177_v29  ;;  %v1126_v5 = vadd.f32 %v1125_v2, %v1063_v44 }
 0x15b   : > { %v1127_v6 = vadd.f32 %v1126_v5, %v1064_v21  ;;  %v992_v17 = vadd.f32 %v991_v3, %v2189_v40 }
 0x15d   : > { %v993_v9 = vadd.f32 %v2171_v23, %v992_v17  ;;  %v1128_v16 = vadd.f32 %v1127_v6, %v1065_v8 }
 0x15f   : > { %v994_v12 = vadd.f32 %v2183_v35, %v993_v9  ;;  %v1129_v14 = vadd.f32 %v1128_v16, %v1066_v59 }
 0x161   : > { %v995_v29 = vrot.slane %v994_v12, 4  ;;  %v1130_v31 = vadd.f32 %v1129_v14, %v1067_v10 }
 0x163   : > { %v996_v15 = vadd.f32 %v995_v29, %v994_v12  ;;  %v1131_v18 = vrot.slane %v1130_v31, 4 }
 0x165   : > { %v997_v20 = vrot.slane %v996_v15, 2  ;;  %v1132_v41 = vadd.f32 %v1131_v18, %v1130_v31 }
 0x167   : > { %v998_v22 = vadd.f32 %v997_v20, %v996_v15  ;;  %v1133_v40 = vrot.slane %v1132_v41, 2 }
 0x169   : > { %v999_v26 = vrot.slane %v998_v22, 1  ;;  %v1134_v24 = vadd.f32 %v1133_v40, %v1132_v41 }
 0x16b   : > { %v1000_v36 = vadd.f32 %v999_v26, %v998_v22  ;;  %v1135_v23 = vrot.slane %v1134_v24, 1 }
 0x16d   : > { %v1001_v30 = vadd.f32 %v1000_v36, %v931_v27  ;;  %v1136_v52 = vadd.f32 %v1135_v23, %v1134_v24 }
 0x16f   : > { %1002 = vst [vmem:[#allocation3] sm:$0x1] %v1001_v30  ;;  %v1137_v33 = vadd.f32 %v1136_v52, %v1003_v28 }
 0x171   : > { %1138 = vst [vmem:[#allocation4] sm:$0x1] %v1137_v33 }
 0x172 PF: > { %p1661_p5 = scmp.ne.s32.totalorder %s1891_s15, 1 }
 0x174   : > { %1142 = sbr.rel (%p1661_p5) target bundleno = 470 (0x1d6), region = 48 }
 0x179   : > { %v1147_v35 = vld [vmem:[#allocation3] sm:$0x1]  ;;  %v1149_v34 = vld [vmem:[#allocation4] sm:$0x1]  ;;  %v1165_v48 = vld [vmem:[#allocation2 + $0xb0] sm:$0xff] }
 0x17a   : > { %v1148_v37 = vmul.f32 0.001953125, %v1147_v35  ;;  %v1150_v0 = vmul.f32 0.001953125, %v1149_v34  ;;  %v1154_v58 = vld [vmem:[%s2445_s2] sm:$0x1]  ;;  %v1166_v25 = vld [vmem:[#allocation2 + $0x1b0] sm:$0xff]  ;;  %v1167_v49 = vld [vmem:[#allocation2 + $0xd8] sm:$0xff] }
 0x17b   : > { %v1159_v13 = vld [vmem:[%s2446_s3] sm:$0x1]  ;;  %v1168_v7 = vld [vmem:[#allocation2 + $0x18] sm:$0xff]  ;;  %v1169_v50 = vld [vmem:[#allocation2 + $0x50] sm:$0xff] }
 0x17c   : > { %v1151_v39 = vmul.f32 %v1148_v37, %v1148_v37  ;;  %v1170_v53 = vld [vmem:[#allocation2 + $0x168] sm:$0xff]  ;;  %v1171_v19 = vld [vmem:[#allocation2 + $0x130] sm:$0xff]  ;;  %v1173_v56 = vld [vmem:[#allocation2 + $0x180] sm:$0xff] }
 0x17d   : > { %v1172_v54 = vld [vmem:[#allocation2 + $0x48] sm:$0xff]  ;;  %v1174_v38 = vld [vmem:[#allocation2 + $0x110] sm:$0xff]  ;;  %v1175_v57 = vld [vmem:[#allocation2 + $0x118] sm:$0xff] }
 0x17e   : > { %v1152_v46 = vsub.f32 %v1150_v0, %v1151_v39  ;;  %v1176_v61 = vld [vmem:[#allocation2 + $0x98] sm:$0xff]  ;;  %v1177_v51 = vld [vmem:[#allocation2 + $0x120] sm:$0xff]  ;;  %v1178_v44 = vld [vmem:[#allocation2 + $0x150] sm:$0xff] }
 0x17f   : > { %v1179_v2 = vld [vmem:[#allocation2 + $0x108] sm:$0xff]  ;;  %v1180_v4 = vld [vmem:[#allocation2 + $0x60] sm:$0xff] }
 0x180   : > { %v1153_v55 = vmax.f32 %v1152_v46, 0.0  ;;  %v1181_v39 = vld [vmem:[#allocation2 + $0xe0] sm:$0xff]  ;;  %v1182_v46 = vld [vmem:[#allocation2 + $0x188] sm:$0xff] }
 0x182   : > { %v1155_v42 = vadd.f32 1e-05, %v1153_v55  ;;  %v1183_v55 = vld [vmem:[#allocation2 + $0x138] sm:$0xff] }
 0x184   : > { %1847 = vrsqrt.f32 %v1155_v42 }
 0x191   : > { %v1848_v43 = vpop.eup %1847 }
 0x192   : > { %v1157_v1 = vmul.f32 %v1848_v43, %v1154_v58 }
 0x194   : > { %1158 = vst [vmem:[#allocation5] sm:$0x1] %v1157_v1  ;;  %v1160_v45 = vmul.f32 %v1157_v1, %v1148_v37 }
 0x196   : > { %v1161_v47 = vsub.f32 %v1159_v13, %v1160_v45  ;;  %v1184_v13 = vld [vmem:[#allocation2 + $0x140] sm:$0xff] }
 0x197   : > { %v1185_v45 = vld [vmem:[#allocation2 + $0x80] sm:$0xff] }
 0x198   : > { %1162 = vst [vmem:[#allocation6] sm:$0x1] %v1161_v47  ;;  %v1186_v47 = vld [vmem:[#allocation2 + $0x1a8] sm:$0xff] }
 0x19b   : > { %v2286_v60 = vld [vmem:[#allocation5] ss:$0 sm:$0xff] }
 0x19c   : > { %v1236_v62 = vmul.f32 %v2286_v60, %v1165_v48  ;;  %v1237_v32 = vmul.f32 %v2286_v60, %v1166_v25  ;;  %v1238_v11 = vmul.f32 %v2286_v60, %v1167_v49  ;;  %v1239_v63 = vmul.f32 %v2286_v60, %v1168_v7 }
 0x19d   : > { %v1240_v3 = vmul.f32 %v2286_v60, %v1169_v50  ;;  %v1241_v21 = vmul.f32 %v2286_v60, %v1170_v53  ;;  %v1242_v5 = vmul.f32 %v2286_v60, %v1171_v19  ;;  %v1243_v6 = vmul.f32 %v2286_v60, %v1172_v54  ;;  %v1187_v50 = vld [vmem:[#allocation2 + $0x1b8] sm:$0xff]  ;;  %v1188_v53 = vld [vmem:[#allocation2 + $0x28] sm:$0xff] }
 0x19e   : > { %v1244_v17 = vmul.f32 %v2286_v60, %v1173_v56  ;;  %v1245_v8 = vmul.f32 %v2286_v60, %v1174_v38  ;;  %v1246_v59 = vmul.f32 %v2286_v60, %v1175_v57  ;;  %v1247_v9 = vmul.f32 %v2286_v60, %v1176_v61 }
 0x19f   : > { %v2300_v16 = vld [vmem:[#allocation6] ss:$0 sm:$0xff]  ;;  %v1248_v10 = vmul.f32 %v2286_v60, %v1177_v51  ;;  %v1249_v12 = vmul.f32 %v2286_v60, %v1178_v44  ;;  %v1250_v14 = vmul.f32 %v2286_v60, %v1179_v2  ;;  %v1251_v29 = vmul.f32 %v2286_v60, %v1180_v4 }
 0x1a0   : > { %v1307_v31 = vadd.f32 %v2300_v16, %v1236_v62  ;;  %v1308_v15 = vadd.f32 %v2300_v16, %v1237_v32  ;;  %v1309_v18 = vadd.f32 %v2300_v16, %v1238_v11  ;;  %v1310_v20 = vadd.f32 %v2300_v16, %v1239_v63 }
 0x1a1   : > { %v1311_v41 = vadd.f32 %v2300_v16, %v1240_v3  ;;  %v1312_v22 = vadd.f32 %v2300_v16, %v1241_v21  ;;  %v1313_v40 = vadd.f32 %v2300_v16, %v1242_v5  ;;  %v1314_v26 = vadd.f32 %v2300_v16, %v1243_v6  ;;  %v1189_v5 = vld [vmem:[#allocation2 + $0x1e8] sm:$0xff]  ;;  %v1190_v6 = vld [vmem:[#allocation2 + $0xf8] sm:$0xff] }
 0x1a2   : > { %v1371_v24 = vmax.f32 %v1307_v31, 0.0  ;;  %v1372_v27 = vmax.f32 %v1308_v15, 0.0  ;;  %v1373_v36 = vmax.f32 %v1309_v18, 0.0  ;;  %v1374_v23 = vmax.f32 %v1310_v20, 0.0 }
 0x1a3   : > { %v1375_v28 = vmax.f32 %v1311_v41, 0.0  ;;  %v1376_v30 = vmax.f32 %v1312_v22, 0.0  ;;  %v1377_v52 = vmax.f32 %v1313_v40, 0.0  ;;  %v1378_v33 = vmax.f32 %v1314_v26, 0.0  ;;  %v1195_v41 = vld [vmem:[#allocation2 + $0xf0] sm:$0xff]  ;;  %v1196_v22 = vld [vmem:[#allocation2 + $0x8] sm:$0xff] }
 0x1a4   : > { %1435 = vst [vmem:[#allocation7] sm:$0xff] %v1371_v24  ;;  %1436 = vst [vmem:[#allocation7 + $0x8] sm:$0xff] %v1372_v27  ;;  %v1315_v35 = vadd.f32 %v2300_v16, %v1244_v17  ;;  %v1316_v34 = vadd.f32 %v2300_v16, %v1245_v8  ;;  %v1317_v37 = vadd.f32 %v2300_v16, %v1246_v59  ;;  %v1191_v17 = vld [vmem:[#allocation2 + $0x160] sm:$0xff] }
 0x1a5   : > { %1437 = vst [vmem:[#allocation7 + $0x10] sm:$0xff] %v1373_v36  ;;  %1438 = vst [vmem:[#allocation7 + $0x18] sm:$0xff] %v1374_v23  ;;  %v1318_v0 = vadd.f32 %v2300_v16, %v1247_v9  ;;  %v1319_v42 = vadd.f32 %v2300_v16, %v1248_v10  ;;  %v1320_v58 = vadd.f32 %v2300_v16, %v1249_v12  ;;  %v1192_v12 = vld [vmem:[#allocation2 + $0x30] sm:$0xff] }
 0x1a6   : > { %1439 = vst [vmem:[#allocation7 + $0x20] sm:$0xff] %v1375_v28  ;;  %1440 = vst [vmem:[#allocation7 + $0x28] sm:$0xff] %v1376_v30  ;;  %v1321_v43 = vadd.f32 %v2300_v16, %v1250_v14  ;;  %v1322_v1 = vadd.f32 %v2300_v16, %v1251_v29  ;;  %v1379_v48 = vmax.f32 %v1315_v35, 0.0  ;;  %v1380_v25 = vmax.f32 %v1316_v34, 0.0  ;;  %v1193_v14 = vld [vmem:[#allocation2 + $0x1e0] sm:$0xff] }
 0x1a7   : > { %1441 = vst [vmem:[#allocation7 + $0x30] sm:$0xff] %v1377_v52  ;;  %1442 = vst [vmem:[#allocation7 + $0x38] sm:$0xff] %v1378_v33  ;;  %v1381_v49 = vmax.f32 %v1317_v37, 0.0  ;;  %v1382_v7 = vmax.f32 %v1318_v0, 0.0  ;;  %v1383_v19 = vmax.f32 %v1319_v42, 0.0  ;;  %v1384_v54 = vmax.f32 %v1320_v58, 0.0 }
 0x1a8   : > { %v1385_v56 = vmax.f32 %v1321_v43, 0.0  ;;  %v1386_v38 = vmax.f32 %v1322_v1, 0.0  ;;  %1443 = vst [vmem:[#allocation7 + $0x40] sm:$0xff] %v1379_v48  ;;  %1444 = vst [vmem:[#allocation7 + $0x48] sm:$0xff] %v1380_v25  ;;  %v1252_v57 = vmul.f32 %v2286_v60, %v1181_v39  ;;  %v1253_v61 = vmul.f32 %v2286_v60, %v1182_v46  ;;  %v1194_v29 = vld [vmem:[#allocation2] sm:$0xff]  ;;  %v1198_v42 = vld [vmem:[#allocation2 + $0x1d0] sm:$0xff] }
 0x1a9   : > { %1445 = vst [vmem:[#allocation7 + $0x50] sm:$0xff] %v1381_v49  ;;  %1446 = vst [vmem:[#allocation7 + $0x58] sm:$0xff] %v1382_v7  ;;  %v1254_v51 = vmul.f32 %v2286_v60, %v1183_v55  ;;  %v1255_v62 = vmul.f32 %v2286_v60, %v1184_v13  ;;  %v1256_v32 = vmul.f32 %v2286_v60, %v1185_v45  ;;  %v1197_v55 = vld [vmem:[#allocation2 + $0x148] sm:$0xff]  ;;  %v1199_v58 = vld [vmem:[#allocation2 + $0x100] sm:$0xff] }
 0x1aa   : > { %1447 = vst [vmem:[#allocation7 + $0x60] sm:$0xff] %v1383_v19  ;;  %1448 = vst [vmem:[#allocation7 + $0x68] sm:$0xff] %v1384_v54  ;;  %v1257_v11 = vmul.f32 %v2286_v60, %v1186_v47  ;;  %v1258_v63 = vmul.f32 %v2286_v60, %v1187_v50  ;;  %v1259_v44 = vmul.f32 %v2286_v60, %v1188_v53  ;;  %v1200_v47 = vld [vmem:[#allocation2 + $0xc8] sm:$0xff]  ;;  %v1201_v48 = vld [vmem:[#allocation2 + $0x40] sm:$0xff] }
 0x1ab   : > { %1449 = vst [vmem:[#allocation7 + $0x70] sm:$0xff] %v1385_v56  ;;  %1450 = vst [vmem:[#allocation7 + $0x78] sm:$0xff] %v1386_v38  ;;  %v1323_v2 = vadd.f32 %v2300_v16, %v1252_v57  ;;  %v1324_v4 = vadd.f32 %v2300_v16, %v1253_v61  ;;  %v1325_v3 = vadd.f32 %v2300_v16, %v1254_v51  ;;  %v1202_v25 = vld [vmem:[#allocation2 + $0x1f8] sm:$0xff]  ;;  %v1203_v19 = vld [vmem:[#allocation2 + $0x20] sm:$0xff] }
 0x1ac   : > { %v1326_v21 = vadd.f32 %v2300_v16, %v1255_v62  ;;  %v1327_v8 = vadd.f32 %v2300_v16, %v1256_v32  ;;  %v1328_v59 = vadd.f32 %v2300_v16, %v1257_v11  ;;  %v1329_v9 = vadd.f32 %v2300_v16, %v1258_v63  ;;  %v1204_v54 = vld [vmem:[#allocation2 + $0x128] sm:$0xff] }
 0x1ad   : > { %v1330_v10 = vadd.f32 %v2300_v16, %v1259_v44  ;;  %v1387_v31 = vmax.f32 %v1323_v2, 0.0  ;;  %v1388_v15 = vmax.f32 %v1324_v4, 0.0  ;;  %v1389_v18 = vmax.f32 %v1325_v3, 0.0 }
 0x1ae   : > { %v1390_v20 = vmax.f32 %v1326_v21, 0.0  ;;  %v1391_v40 = vmax.f32 %v1327_v8, 0.0  ;;  %v1392_v26 = vmax.f32 %v1328_v59, 0.0  ;;  %v1393_v24 = vmax.f32 %v1329_v9, 0.0  ;;  %v1206_v8 = vld [vmem:[#allocation2 + $0x1f0] sm:$0xff]  ;;  %v1207_v59 = vld [vmem:[#allocation2 + $0xe8] sm:$0xff] }
 0x1af   : > { %v1394_v27 = vmax.f32 %v1330_v10, 0.0  ;;  %1451 = vst [vmem:[#allocation7 + $0x80] sm:$0xff] %v1387_v31  ;;  %1452 = vst [vmem:[#allocation7 + $0x88] sm:$0xff] %v1388_v15  ;;  %v1260_v36 = vmul.f32 %v2286_v60, %v1189_v5  ;;  %v1261_v23 = vmul.f32 %v2286_v60, %v1190_v6  ;;  %v1262_v28 = vmul.f32 %v2286_v60, %v1191_v17  ;;  %v1205_v17 = vld [vmem:[#allocation2 + $0x1a0] sm:$0xff]  ;;  %v1209_v31 = vld [vmem:[#allocation2 + $0x70] sm:$0xff] }
 0x1b0   : > { %1453 = vst [vmem:[#allocation7 + $0x90] sm:$0xff] %v1389_v18  ;;  %1454 = vst [vmem:[#allocation7 + $0x98] sm:$0xff] %v1390_v20  ;;  %v1263_v30 = vmul.f32 %v2286_v60, %v1192_v12  ;;  %v1264_v52 = vmul.f32 %v2286_v60, %v1193_v14  ;;  %v1265_v33 = vmul.f32 %v2286_v60, %v1194_v29  ;;  %v1208_v29 = vld [vmem:[#allocation2 + $0x78] sm:$0xff]  ;;  %v1210_v15 = vld [vmem:[#allocation2 + $0x90] sm:$0xff] }
 0x1b1   : > { %1455 = vst [vmem:[#allocation7 + $0xa0] sm:$0xff] %v1391_v40  ;;  %1456 = vst [vmem:[#allocation7 + $0xa8] sm:$0xff] %v1392_v26  ;;  %v1266_v35 = vmul.f32 %v2286_v60, %v1195_v41  ;;  %v1267_v34 = vmul.f32 %v2286_v60, %v1196_v22  ;;  %v1331_v37 = vadd.f32 %v2300_v16, %v1260_v36  ;;  %v1211_v40 = vld [vmem:[#allocation2 + $0x1d8] sm:$0xff]  ;;  %v1212_v26 = vld [vmem:[#allocation2 + $0xd0] sm:$0xff] }
 0x1b2   : > { %1457 = vst [vmem:[#allocation7 + $0xb0] sm:$0xff] %v1393_v24  ;;  %1458 = vst [vmem:[#allocation7 + $0xb8] sm:$0xff] %v1394_v27  ;;  %v1332_v0 = vadd.f32 %v2300_v16, %v1261_v23  ;;  %v1333_v39 = vadd.f32 %v2300_v16, %v1262_v28  ;;  %v1334_v46 = vadd.f32 %v2300_v16, %v1263_v30 }
 0x1b3   : > { %v1335_v43 = vadd.f32 %v2300_v16, %v1264_v52  ;;  %v1336_v1 = vadd.f32 %v2300_v16, %v1265_v33  ;;  %v1337_v13 = vadd.f32 %v2300_v16, %v1266_v35  ;;  %v1338_v45 = vadd.f32 %v2300_v16, %v1267_v34 }
 0x1b4   : > { %v1395_v49 = vmax.f32 %v1331_v37, 0.0  ;;  %v1396_v7 = vmax.f32 %v1332_v0, 0.0  ;;  %v1397_v50 = vmax.f32 %v1333_v39, 0.0  ;;  %v1398_v53 = vmax.f32 %v1334_v46, 0.0 }
 0x1b5   : > { %v1399_v56 = vmax.f32 %v1335_v43, 0.0  ;;  %v1400_v38 = vmax.f32 %v1336_v1, 0.0  ;;  %v1401_v57 = vmax.f32 %v1337_v13, 0.0  ;;  %v1402_v61 = vmax.f32 %v1338_v45, 0.0  ;;  %v1214_v43 = vld [vmem:[#allocation2 + $0x88] sm:$0xff] }
 0x1b6   : > { %1459 = vst [vmem:[#allocation7 + $0xc0] sm:$0xff] %v1395_v49  ;;  %1460 = vst [vmem:[#allocation7 + $0xc8] sm:$0xff] %v1396_v7  ;;  %v1268_v51 = vmul.f32 %v2286_v60, %v1197_v55  ;;  %v1269_v62 = vmul.f32 %v2286_v60, %v1198_v42  ;;  %v1270_v32 = vmul.f32 %v2286_v60, %v1199_v58  ;;  %v1213_v58 = vld [vmem:[#allocation2 + $0xb8] sm:$0xff]  ;;  %v1215_v1 = vld [vmem:[#allocation2 + $0xa8] sm:$0xff] }
 0x1b7   : > { %1461 = vst [vmem:[#allocation7 + $0xd0] sm:$0xff] %v1397_v50  ;;  %1462 = vst [vmem:[#allocation7 + $0xd8] sm:$0xff] %v1398_v53  ;;  %v1271_v11 = vmul.f32 %v2286_v60, %v1200_v47  ;;  %v1272_v63 = vmul.f32 %v2286_v60, %v1201_v48  ;;  %v1273_v44 = vmul.f32 %v2286_v60, %v1202_v25  ;;  %v1216_v25 = vld [vmem:[#allocation2 + $0x1c8] sm:$0xff]  ;;  %v1217_v49 = vld [vmem:[#allocation2 + $0x170] sm:$0xff] }
 0x1b8   : > { %1463 = vst [vmem:[#allocation7 + $0xe0] sm:$0xff] %v1399_v56  ;;  %1464 = vst [vmem:[#allocation7 + $0xe8] sm:$0xff] %v1400_v38  ;;  %v1274_v2 = vmul.f32 %v2286_v60, %v1203_v19  ;;  %v1275_v4 = vmul.f32 %v2286_v60, %v1204_v54  ;;  %v1339_v3 = vadd.f32 %v2300_v16, %v1268_v51  ;;  %v1218_v7 = vld [vmem:[#allocation2 + $0x178] sm:$0xff]  ;;  %v1219_v56 = vld [vmem:[#allocation2 + $0x68] sm:$0xff] }
 0x1b9   : > { %1465 = vst [vmem:[#allocation7 + $0xf0] sm:$0xff] %v1401_v57  ;;  %1466 = vst [vmem:[#allocation7 + $0xf8] sm:$0xff] %v1402_v61  ;;  %v1340_v21 = vadd.f32 %v2300_v16, %v1269_v62  ;;  %v1341_v5 = vadd.f32 %v2300_v16, %v1270_v32  ;;  %v1342_v6 = vadd.f32 %v2300_v16, %v1271_v11  ;;  %v1220_v38 = vld [vmem:[#allocation2 + $0x190] sm:$0xff] }
 0x1ba   : > { %v1343_v9 = vadd.f32 %v2300_v16, %v1272_v63  ;;  %v1344_v10 = vadd.f32 %v2300_v16, %v1273_v44  ;;  %v1345_v12 = vadd.f32 %v2300_v16, %v1274_v2  ;;  %v1346_v14 = vadd.f32 %v2300_v16, %v1275_v4 }
 0x1bb   : > { %v1403_v18 = vmax.f32 %v1339_v3, 0.0  ;;  %v1404_v20 = vmax.f32 %v1340_v21, 0.0  ;;  %v1405_v41 = vmax.f32 %v1341_v5, 0.0  ;;  %v1406_v22 = vmax.f32 %v1342_v6, 0.0 }
 0x1bc   : > { %v1407_v24 = vmax.f32 %v1343_v9, 0.0  ;;  %v1408_v27 = vmax.f32 %v1344_v10, 0.0  ;;  %v1409_v36 = vmax.f32 %v1345_v12, 0.0  ;;  %v1410_v23 = vmax.f32 %v1346_v14, 0.0  ;;  %v1222_v9 = vld [vmem:[#allocation2 + $0x38] sm:$0xff]  ;;  %v1223_v10 = vld [vmem:[#allocation2 + $0xc0] sm:$0xff] }
 0x1bd   : > { %1467 = vst [vmem:[#allocation7 + $0x100] sm:$0xff] %v1403_v18  ;;  %1468 = vst [vmem:[#allocation7 + $0x108] sm:$0xff] %v1404_v20  ;;  %v1276_v28 = vmul.f32 %v2286_v60, %v1205_v17  ;;  %v1277_v30 = vmul.f32 %v2286_v60, %v1206_v8  ;;  %v1278_v52 = vmul.f32 %v2286_v60, %v1207_v59  ;;  %v1221_v59 = vld [vmem:[#allocation2 + $0x198] sm:$0xff]  ;;  %v1226_v20 = vld [vmem:[#allocation2 + $0x10] sm:$0xff] }
 0x1be   : > { %1469 = vst [vmem:[#allocation7 + $0x110] sm:$0xff] %v1405_v41  ;;  %1470 = vst [vmem:[#allocation7 + $0x118] sm:$0xff] %v1406_v22  ;;  %v1279_v33 = vmul.f32 %v2286_v60, %v1208_v29  ;;  %v1280_v35 = vmul.f32 %v2286_v60, %v1209_v31  ;;  %v1281_v34 = vmul.f32 %v2286_v60, %v1210_v15  ;;  %v1224_v15 = vld [vmem:[#allocation2 + $0x1c0] sm:$0xff]  ;;  %v1225_v18 = vld [vmem:[#allocation2 + $0x158] sm:$0xff] }
 0x1bf   : > { %1471 = vst [vmem:[#allocation7 + $0x120] sm:$0xff] %v1407_v24  ;;  %1472 = vst [vmem:[#allocation7 + $0x128] sm:$0xff] %v1408_v27  ;;  %v1282_v37 = vmul.f32 %v2286_v60, %v1211_v40  ;;  %v1283_v0 = vmul.f32 %v2286_v60, %v1212_v26  ;;  %v1347_v39 = vadd.f32 %v2300_v16, %v1276_v28  ;;  %v1227_v24 = vld [vmem:[#allocation2 + $0x58] sm:$0xff]  ;;  %v1228_v27 = vld [vmem:[#allocation2 + $0xa0] sm:$0xff] }
 0x1c0   : > { %1473 = vst [vmem:[#allocation7 + $0x130] sm:$0xff] %v1409_v36  ;;  %1474 = vst [vmem:[#allocation7 + $0x138] sm:$0xff] %v1410_v23  ;;  %v1348_v46 = vadd.f32 %v2300_v16, %v1277_v30  ;;  %v1349_v55 = vadd.f32 %v2300_v16, %v1278_v52  ;;  %v1350_v42 = vadd.f32 %v2300_v16, %v1279_v33 }
 0x1c1   : > { %v1351_v13 = vadd.f32 %v2300_v16, %v1280_v35  ;;  %v1352_v45 = vadd.f32 %v2300_v16, %v1281_v34  ;;  %v1353_v47 = vadd.f32 %v2300_v16, %v1282_v37  ;;  %v1354_v48 = vadd.f32 %v2300_v16, %v1283_v0 }
 0x1c2   : > { %v1411_v50 = vmax.f32 %v1347_v39, 0.0  ;;  %v1412_v53 = vmax.f32 %v1348_v46, 0.0  ;;  %v1413_v19 = vmax.f32 %v1349_v55, 0.0  ;;  %v1414_v54 = vmax.f32 %v1350_v42, 0.0 }
 0x1c3   : > { %v1415_v57 = vmax.f32 %v1351_v13, 0.0  ;;  %v1416_v61 = vmax.f32 %v1352_v45, 0.0  ;;  %v1417_v51 = vmax.f32 %v1353_v47, 0.0  ;;  %v1418_v62 = vmax.f32 %v1354_v48, 0.0 }
 0x1c4   : > { %1475 = vst [vmem:[#allocation7 + $0x140] sm:$0xff] %v1411_v50  ;;  %1476 = vst [vmem:[#allocation7 + $0x148] sm:$0xff] %v1412_v53  ;;  %v1284_v32 = vmul.f32 %v2286_v60, %v1213_v58  ;;  %v1285_v11 = vmul.f32 %v2286_v60, %v1214_v43  ;;  %v1286_v63 = vmul.f32 %v2286_v60, %v1215_v1 }
 0x1c5   : > { %1477 = vst [vmem:[#allocation7 + $0x150] sm:$0xff] %v1413_v19  ;;  %1478 = vst [vmem:[#allocation7 + $0x158] sm:$0xff] %v1414_v54  ;;  %v1287_v44 = vmul.f32 %v2286_v60, %v1216_v25  ;;  %v1288_v2 = vmul.f32 %v2286_v60, %v1217_v49  ;;  %v1289_v4 = vmul.f32 %v2286_v60, %v1218_v7 }
 0x1c6   : > { %1479 = vst [vmem:[#allocation7 + $0x160] sm:$0xff] %v1415_v57  ;;  %1480 = vst [vmem:[#allocation7 + $0x168] sm:$0xff] %v1416_v61  ;;  %v1290_v3 = vmul.f32 %v2286_v60, %v1219_v56  ;;  %v1291_v21 = vmul.f32 %v2286_v60, %v1220_v38  ;;  %v1355_v5 = vadd.f32 %v2300_v16, %v1284_v32 }
 0x1c7   : > { %1481 = vst [vmem:[#allocation7 + $0x170] sm:$0xff] %v1417_v51  ;;  %1482 = vst [vmem:[#allocation7 + $0x178] sm:$0xff] %v1418_v62  ;;  %v1356_v6 = vadd.f32 %v2300_v16, %v1285_v11  ;;  %v1357_v17 = vadd.f32 %v2300_v16, %v1286_v63  ;;  %v1358_v8 = vadd.f32 %v2300_v16, %v1287_v44 }
 0x1c8   : > { %v1359_v12 = vadd.f32 %v2300_v16, %v1288_v2  ;;  %v1360_v14 = vadd.f32 %v2300_v16, %v1289_v4  ;;  %v1361_v29 = vadd.f32 %v2300_v16, %v1290_v3  ;;  %v1362_v31 = vadd.f32 %v2300_v16, %v1291_v21 }
 0x1c9   : > { %v1419_v41 = vmax.f32 %v1355_v5, 0.0  ;;  %v1420_v22 = vmax.f32 %v1356_v6, 0.0  ;;  %v1421_v40 = vmax.f32 %v1357_v17, 0.0  ;;  %v1422_v26 = vmax.f32 %v1358_v8, 0.0 }
 0x1ca   : > { %v1423_v36 = vmax.f32 %v1359_v12, 0.0  ;;  %v1424_v23 = vmax.f32 %v1360_v14, 0.0  ;;  %v1425_v28 = vmax.f32 %v1361_v29, 0.0  ;;  %v1426_v30 = vmax.f32 %v1362_v31, 0.0 }
 0x1cb   : > { %1483 = vst [vmem:[#allocation7 + $0x180] sm:$0xff] %v1419_v41  ;;  %1484 = vst [vmem:[#allocation7 + $0x188] sm:$0xff] %v1420_v22  ;;  %v1292_v52 = vmul.f32 %v2286_v60, %v1221_v59  ;;  %v1293_v33 = vmul.f32 %v2286_v60, %v1222_v9  ;;  %v1294_v35 = vmul.f32 %v2286_v60, %v1223_v10 }
 0x1cc   : > { %1485 = vst [vmem:[#allocation7 + $0x190] sm:$0xff] %v1421_v40  ;;  %1486 = vst [vmem:[#allocation7 + $0x198] sm:$0xff] %v1422_v26  ;;  %v1295_v34 = vmul.f32 %v2286_v60, %v1224_v15  ;;  %v1296_v37 = vmul.f32 %v2286_v60, %v1225_v18  ;;  %v1297_v0 = vmul.f32 %v2286_v60, %v1226_v20 }
 0x1cd   : > { %1487 = vst [vmem:[#allocation7 + $0x1a0] sm:$0xff] %v1423_v36  ;;  %1488 = vst [vmem:[#allocation7 + $0x1a8] sm:$0xff] %v1424_v23  ;;  %v1298_v39 = vmul.f32 %v2286_v60, %v1227_v24  ;;  %v1299_v46 = vmul.f32 %v2286_v60, %v1228_v27  ;;  %v1363_v55 = vadd.f32 %v2300_v16, %v1292_v52 }
 0x1ce   : > { %1489 = vst [vmem:[#allocation7 + $0x1b0] sm:$0xff] %v1425_v28  ;;  %1490 = vst [vmem:[#allocation7 + $0x1b8] sm:$0xff] %v1426_v30  ;;  %v1364_v42 = vadd.f32 %v2300_v16, %v1293_v33  ;;  %v1365_v58 = vadd.f32 %v2300_v16, %v1294_v35  ;;  %v1366_v43 = vadd.f32 %v2300_v16, %v1295_v34 }
 0x1cf   : > { %v1367_v1 = vadd.f32 %v2300_v16, %v1296_v37  ;;  %v1368_v13 = vadd.f32 %v2300_v16, %v1297_v0  ;;  %v1369_v45 = vadd.f32 %v2300_v16, %v1298_v39  ;;  %v1370_v47 = vadd.f32 %v2300_v16, %v1299_v46 }
 0x1d0   : > { %v1427_v48 = vmax.f32 %v1363_v55, 0.0  ;;  %v1428_v25 = vmax.f32 %v1364_v42, 0.0  ;;  %v1429_v49 = vmax.f32 %v1365_v58, 0.0  ;;  %v1430_v60 = vmax.f32 %v1366_v43, 0.0 }
 0x1d1   : > { %v1431_v7 = vmax.f32 %v1367_v1, 0.0  ;;  %v1432_v50 = vmax.f32 %v1368_v13, 0.0  ;;  %v1433_v53 = vmax.f32 %v1369_v45, 0.0  ;;  %v1434_v19 = vmax.f32 %v1370_v47, 0.0 }
 0x1d2   : > { %1491 = vst [vmem:[#allocation7 + $0x1c0] sm:$0xff] %v1427_v48  ;;  %1492 = vst [vmem:[#allocation7 + $0x1c8] sm:$0xff] %v1428_v25 }
 0x1d3   : > { %1493 = vst [vmem:[#allocation7 + $0x1d0] sm:$0xff] %v1429_v49  ;;  %1494 = vst [vmem:[#allocation7 + $0x1d8] sm:$0xff] %v1430_v60 }
 0x1d4   : > { %1495 = vst [vmem:[#allocation7 + $0x1e0] sm:$0xff] %v1431_v7  ;;  %1496 = vst [vmem:[#allocation7 + $0x1e8] sm:$0xff] %v1432_v50 }
 0x1d5   : > { %1497 = vst [vmem:[#allocation7 + $0x1f0] sm:$0xff] %v1433_v53  ;;  %1498 = vst [vmem:[#allocation7 + $0x1f8] sm:$0xff] %v1434_v19 }
 0x1d6 PF: > { %p2420_p6 = scmp.eq.s32.totalorder %s1588_s18, 1  ;;  %s1902_s7 = smov [#allocation7]  }
 0x1d7   : > { %s1514_s8 = sshll.u32 %s1902_s7, 4  ;;  %s1515_s8 = int_to_ptr.vmem [resolvable:$true] %s1514_s8 }
 0x1d8   : > { %s1849_s9 = scalar_lea.vmem %s1515_s8, 8192  ;;  %s1855_s10 = scalar_lea.vmem %s1515_s8, 16384 }
 0x1d9   : > { %p1850_p7 = scmp.ne.s32.totalorder %s1515_s8, %s1849_s9  ;;  %p1856_p10 = scmp.lt.s32.totalorder %s1515_s8, %s1515_s8 }
 0x1da   : > { %p1857_p11 = scmp.lt.s32.totalorder %s1855_s10, %s1849_s9 }
 0x1db   : > { %p1851_p8 = pnand %p1850_p7, %p2420_p6 }
 0x1dc   : > { %p1858_p12 = por %p1857_p11, %p1856_p10 }
 0x1dd   : > { %p1852_p9 = pneg %p1851_p8 }
 0x1df   : > { %p1859_p13 = pnand %p1858_p12, %p1852_p9 }
 0x1e1   : > { %1862 = shalt.err (!%p1859_p13)
}
 0x1e2   : > { %s1903_s11 = smov 128   ;;  %s1904_s18 = smov 8  }
 0x1e3   : > { %1775 = dma.vmem_to_hbm [thread:$0]  (%p2420_p6), %s1515_s8, 8192, %s2447_s4, [#allocation8], %s1903_s11, %s1903_s11, %s1904_s18  }
 0x1e4 PF: > { %p1783_p0 = scmp.ge.s32.totalorder %s1899_s17, 2  ;;  %p1784_p1 = scmp.eq.s32.totalorder %s1589_s19, 1 }
 0x1e6   : > { %p1779_p2 = pnand %p1784_p1, %p1783_p0 }
 0x1e8   : > { %p1780_p3 = pneg %p1779_p2 }
 0x1ea   : > { %1886 = dma.done.wait (%p1780_p3), [#allocation8], 8192  }
 0x1eb   : > { %1888 = vsyncadd (%p1780_p3), [#allocation8], 4294959104  ;;  %s17_s17 = sadd.s32 1, %s1899_s17   ;;  %s2449_s15 = smov %s1895_s16 }
 0x1ec   : > { %p14_p4 = scmp.ge.s32.totalorder %s17_s17, 4   ;;  %s2450_s16 = smov %s2452_s20 }
 0x1ee   :  { %16 = sbr.rel (!%p14_p4) target bundleno = 3 (0x3), region = 89 }
 0x1f3   :  { %1535 = vsyncpa [#allocation8], 1 }
 0x1f4   :  { %1537 = vsyncpa [#allocation8 + $0x1], 1 }

</bundles_post_ra>
